<compile_context>
chip_gen: v7x
topology: tpu7x:2x2x1
jax: 0.10.0
libtpu: 0.0.40
codegen_flags: <defaults>
</compile_context>

<pallas_src>
import functools
import math

import jax
import jax.numpy as jnp
from jax.experimental import pallas as pl
from jax.experimental.pallas import tpu as pltpu


# -----------------------------------------------------------------------------
# Fused kernel: all encoder layers, one batch tile per "parallel" grid step.
# -----------------------------------------------------------------------------
def _temporal_encoder_kernel(
        x_ref,                                   # (bt, S, D)
        wqkv_ref,                                # (1, 3, D, D)  [Wq^T*scale|Wk^T|Wv^T]
        wo_ref,                                  # (1, D, D)     Wo^T
        w1_ref,                                  # (1, D, F)     W1^T
        w2_ref,                                  # (1, F, D)     W2^T
        vec_ref,                                 # (1, 9, D) f32 packed small vectors
        bb1_ref,                                 # (1, 1, F) f32 linear1 bias
        o_ref,                                   # (bt, S, D)
        h_ref,                                   # scratch (bt*S, D) f32, resident
        *, nhead, eps, approx_recip):
    bt, S, D = x_ref.shape
    N = bt * S
    hd = D // nhead
    cdt = wqkv_ref.dtype                         # bf16 (fast path) or f32

    layer = pl.program_id(1)

    # Load the activation into the resident VMEM scratch at the first layer.
    @pl.when(layer == 0)
    def _():
        h_ref[...] = x_ref[...].reshape(N, D).astype(jnp.float32)

    x = h_ref[...]                                # (N, D) f32
    xc = x.astype(cdt)

    # Packed per-layer vectors (one DMA): rows are
    # [bq*scale, bk, bv, bo, g1, b1, bb2, g2, b2].
    vec = vec_ref[0]                              # (9, D) f32
    bq, bk, bv = vec[0:1], vec[1:2], vec[2:3]
    bo, g1, b1 = vec[3:4], vec[4:5], vec[5:6]
    bb2, g2, b2 = vec[6:7], vec[7:8], vec[8:9]

    # --- Q/K/V: three lane-dense (N,D)@(D,D) MXU matmuls; 1/sqrt(hd) folded
    #     into Wq / bq at weight-prep time (no runtime score scaling).
    q = jnp.dot(xc, wqkv_ref[0, 0], preferred_element_type=jnp.float32) + bq
    k = jnp.dot(xc, wqkv_ref[0, 1], preferred_element_type=jnp.float32) + bk
    v = jnp.dot(xc, wqkv_ref[0, 2], preferred_element_type=jnp.float32) + bv

    # --- attention core: batched over the real batch dim, per-head static loop.
    head_outs = []
    for h in range(nhead):                        # static, small (nhead)
        sl = slice(h * hd, (h + 1) * hd)          # static lane slice
        qh = q[:, sl].astype(cdt).reshape(bt, S, hd)
        kh = k[:, sl].astype(cdt).reshape(bt, S, hd)
        vh = v[:, sl].astype(cdt).reshape(bt, S, hd)

        s = jnp.einsum('bqe,bke->bqk', qh, kh,
                       preferred_element_type=jnp.float32)      # (bt, S, S) f32
        s = s - jnp.max(s, axis=-1, keepdims=True)
        p = jnp.exp(s)
        p = p * pl.reciprocal(jnp.sum(p, axis=-1, keepdims=True),
                              approx=approx_recip)
        oh = jnp.einsum('bqk,bke->bqe', p.astype(cdt), vh,
                        preferred_element_type=jnp.float32)     # (bt, S, hd)
        head_outs.append(oh.reshape(N, hd))

    attn_in = (jnp.concatenate(head_outs, axis=-1)
               if nhead > 1 else head_outs[0])                  # (N, D)

    # --- output projection: one full-depth (K=D) matmul.
    attn = jnp.dot(attn_in.astype(cdt), wo_ref[0],
                   preferred_element_type=jnp.float32) + bo     # (N, D)

    # --- residual + LayerNorm (post-norm, PyTorch norm_first=False) ---
    h1 = x + attn
    mu = jnp.mean(h1, axis=-1, keepdims=True)
    var = jnp.mean((h1 - mu) ** 2, axis=-1, keepdims=True)
    h1n = (h1 - mu) * jax.lax.rsqrt(var + eps) * g1 + b1

    # --- feed-forward (relu), weights pre-transposed in the wrapper ---
    ff = jnp.dot(h1n.astype(cdt), w1_ref[0],
                 preferred_element_type=jnp.float32) + bb1_ref[0]   # (N, F)
    ff = jnp.maximum(ff, 0.0)
    ff = jnp.dot(ff.astype(cdt), w2_ref[0],
                 preferred_element_type=jnp.float32) + bb2          # (N, D)

    h2 = h1n + ff
    mu2 = jnp.mean(h2, axis=-1, keepdims=True)
    var2 = jnp.mean((h2 - mu2) ** 2, axis=-1, keepdims=True)
    h2n = (h2 - mu2) * jax.lax.rsqrt(var2 + eps) * g2 + b2

    h_ref[...] = h2n                              # stays resident for next layer

    @pl.when(layer == pl.num_programs(1) - 1)
    def _():
        o_ref[...] = h2n.reshape(bt, S, D).astype(o_ref.dtype)


# -----------------------------------------------------------------------------
# Wrapper: weight re-layout (done once, outside the kernel) + pallas_call.
# -----------------------------------------------------------------------------
def _stack_layer_params(layer_params, nhead, mxu_dtype):
    """PyTorch-layout per-layer params -> kernel-layout arrays stacked over layers."""
    D = layer_params[0][2].shape[0]               # out_proj.weight is (D, D)
    hd = D // nhead
    scale = 1.0 / math.sqrt(hd)

    wqkv_l, wo_l, w1_l, w2_l, vec_l, bb1_l = [], [], [], [], [], []
    for p in layer_params:
        wqkv, bqkv, wo, bo, g1, b1, w1, bb1, w2, bb2, g2, b2 = p
        wq_t = jnp.transpose(wqkv[:D]) * scale            # (D, D), scale folded
        wk_t = jnp.transpose(wqkv[D:2 * D])
        wv_t = jnp.transpose(wqkv[2 * D:])
        wqkv_l.append(jnp.stack([wq_t, wk_t, wv_t], 0).astype(mxu_dtype))  # (3,D,D)
        wo_l.append(jnp.transpose(wo).astype(mxu_dtype))                   # (D, D)
        w1_l.append(jnp.transpose(w1).astype(mxu_dtype))                   # (D, F)
        w2_l.append(jnp.transpose(w2).astype(mxu_dtype))                   # (F, D)
        vec = jnp.stack(
            [bqkv[0, :D] * scale, bqkv[0, D:2 * D], bqkv[0, 2 * D:],
             bo[0], g1[0], b1[0], bb2[0], g2[0], b2[0]], axis=0)           # (9, D)
        vec_l.append(vec.astype(jnp.float32))
        bb1_l.append(bb1.astype(jnp.float32))                              # (1, F)

    return (jnp.stack(wqkv_l), jnp.stack(wo_l), jnp.stack(w1_l),
            jnp.stack(w2_l), jnp.stack(vec_l), jnp.stack(bb1_l))


def _tensorcores_sharing_grid():
    """Best-effort: #TensorCores that a single pallas_call grid is sharded over."""
    try:
        kind = jax.devices()[0].device_kind.lower()
    except Exception:
        return 1
    return 2 if any(tag in kind for tag in ("v4", "v5p", "v7")) else 1


def temporal_encoder_forward(frame_features, expansion_tokens, layer_params, nhead,
                             *, fast_math=True, batch_tile=None, eps=1e-5,
                             vmem_limit_bytes=None):
    """frame_features: (B, num_frames, D); expansion_tokens: (1, T, D)."""
    B = frame_features.shape[0]
    exp = jnp.broadcast_to(expansion_tokens, (B,) + expansion_tokens.shape[1:])
    x = jnp.concatenate([frame_features, exp], axis=1)            # (B, S, D)
    _, S, D = x.shape
    L = len(layer_params)
    F = layer_params[0][6].shape[0]                               # linear1.weight (F, D)
    assert D % nhead == 0

    if batch_tile is None:
        ntc = _tensorcores_sharing_grid()
        if ntc > 1 and B >= ntc and B % ntc == 0:
            batch_tile = B // ntc        # one tile per TensorCore (v4/v5p/v7x)
        else:
            batch_tile = B               # single TC (v5e/v6e): weights DMA'd once
    assert B % batch_tile == 0
    nbt = B // batch_tile

    mxu_dtype = jnp.bfloat16 if fast_math else jnp.float32
    stacked = _stack_layer_params(layer_params, nhead, mxu_dtype)

    # --- explicit scoped-VMEM budget (double-buffered blocks + intermediates) ---
    if vmem_limit_bytes is None:
        wb = jnp.dtype(mxu_dtype).itemsize
        per_layer_w = (3 * D * D + D * D + 2 * D * F) * wb + (9 * D + F) * 4
        x_blk = batch_tile * S * D * jnp.dtype(x.dtype).itemsize
        n = batch_tile * S
        interm = n * (10 * D + 2 * F) * 4 + batch_tile * S * S * 4 * 3
        est = 2 * per_layer_w + 4 * x_blk + n * D * 4 + interm
        vmem_limit_bytes = int(min(max(2 * est + (2 << 20), 8 << 20), 64 << 20))

    def _wspec(tail):
        nd = len(tail)
        return pl.BlockSpec((1,) + tail, lambda i, l, _nd=nd: (l,) + (0,) * _nd)

    in_specs = [pl.BlockSpec((batch_tile, S, D), lambda i, l: (i, 0, 0))]
    in_specs += [
        _wspec((3, D, D)),    # wqkv (stacked q/k/v weights, one DMA)
        _wspec((D, D)),       # wo
        _wspec((D, F)),       # w1
        _wspec((F, D)),       # w2
        _wspec((9, D)),       # packed small vectors
        _wspec((1, F)),       # linear1 bias
    ]

    kernel = functools.partial(_temporal_encoder_kernel, nhead=nhead, eps=eps,
                               approx_recip=fast_math)

    return pl.pallas_call(
        kernel,
        out_shape=jax.ShapeDtypeStruct((B, S, D), x.dtype),
        grid_spec=pltpu.PrefetchScalarGridSpec(
            num_scalar_prefetch=0,
            grid=(nbt, L),                                        # layers innermost
            in_specs=in_specs,
            out_specs=pl.BlockSpec((batch_tile, S, D), lambda i, l: (i, 0, 0)),
            scratch_shapes=[pltpu.VMEM((batch_tile * S, D), jnp.float32)],
        ),
        compiler_params=pltpu.CompilerParams(
            dimension_semantics=("parallel", "arbitrary"),
            vmem_limit_bytes=vmem_limit_bytes),
    )(x, *stacked)


# -----------------------------------------------------------------------------
# Pure-JAX reference (module semantics, f32) for correctness checks.
# -----------------------------------------------------------------------------
def _ref_layer(x, params, nhead, eps=1e-5):
    wqkv, bqkv, wo, bo, g1, b1, w1, bb1, w2, bb2, g2, b2 = params
    S, D = x.shape[1], x.shape[2]
    hd = D // nhead
    qkv = x @ wqkv.T + bqkv[0]
    q, k, v = qkv[..., :D], qkv[..., D:2 * D], qkv[..., 2 * D:]

    def split(t):  # (B,S,D) -> (B,H,S,hd)
        return t.reshape(t.shape[0], S, nhead, hd).transpose(0, 2, 1, 3)

    qh, kh, vh = split(q), split(k), split(v)
    s = jnp.einsum("bhqd,bhkd->bhqk", qh, kh) / math.sqrt(hd)
    p = jax.nn.softmax(s, axis=-1)
    a = jnp.einsum("bhqk,bhkd->bhqd", p, vh).transpose(0, 2, 1, 3).reshape(
        x.shape[0], S, D)
    a = a @ wo.T + bo[0]

    def ln(t, g, b):
        mu = t.mean(-1, keepdims=True)
        var = ((t - mu) ** 2).mean(-1, keepdims=True)
        return (t - mu) / jnp.sqrt(var + eps) * g[0] + b[0]

    h1 = ln(x + a, g1, b1)
    ff = jax.nn.relu(h1 @ w1.T + bb1[0]) @ w2.T + bb2[0]
    return ln(h1 + ff, g2, b2)


def _ref_forward(frame_features, expansion_tokens, layer_params, nhead):
    B = frame_features.shape[0]
    exp = jnp.broadcast_to(expansion_tokens, (B,) + expansion_tokens.shape[1:])
    x = jnp.concatenate([frame_features, exp], axis=1)
    for p in layer_params:
        x = _ref_layer(x, p, nhead)
    return x


# -----------------------------------------------------------------------------
# Deterministic parameter init + demo
# -----------------------------------------------------------------------------
def init_params(key, d_model, nhead, num_layers, dim_ff, num_exp_tokens):
    keys = jax.random.split(key, 1 + num_layers)
    # nn.init.normal_(std=0.02) for the expansion tokens
    exp_tokens = 0.02 * jax.random.normal(
        keys[0], (1, num_exp_tokens, d_model), jnp.float32)

    layer_params = []
    for li in range(num_layers):
        ks = jax.random.split(keys[1 + li], 12)
        sc = 0.05
        p = (
            sc * jax.random.normal(ks[0], (3 * d_model, d_model), jnp.float32),  # in_proj_weight
            sc * jax.random.normal(ks[1], (1, 3 * d_model), jnp.float32),        # in_proj_bias
            sc * jax.random.normal(ks[2], (d_model, d_model), jnp.float32),      # out_proj.weight
            sc * jax.random.normal(ks[3], (1, d_model), jnp.float32),            # out_proj.bias
            jnp.ones((1, d_model), jnp.float32),                                 # norm1.weight
            jnp.zeros((1, d_model), jnp.float32),                                # norm1.bias
            sc * jax.random.normal(ks[4], (dim_ff, d_model), jnp.float32),       # linear1.weight
            sc * jax.random.normal(ks[5], (1, dim_ff), jnp.float32),             # linear1.bias
            sc * jax.random.normal(ks[6], (d_model, dim_ff), jnp.float32),       # linear2.weight
            sc * jax.random.normal(ks[7], (1, d_model), jnp.float32),            # linear2.bias
            jnp.ones((1, d_model), jnp.float32),                                 # norm2.weight
            jnp.zeros((1, d_model), jnp.float32),                                # norm2.bias
        )
        layer_params.append(p)
    return exp_tokens, layer_params


if __name__ == "__main__":
    # Small shapes consistent with the module's forward.
    batch = 2
    num_frames = 8
    d_model = 32
    nhead = 4
    num_layers = 2
    dim_feedforward = 64
    num_visual_expansion_tokens = 2

    key = jax.random.PRNGKey(0)
    k_in, k_par = jax.random.split(key)
    frame_features = jax.random.normal(
        k_in, (batch, num_frames, d_model), jnp.float32)

    exp_tokens, layer_params = init_params(
        k_par, d_model, nhead, num_layers, dim_feedforward,
        num_visual_expansion_tokens)

    expected_shape = (batch, num_frames + num_visual_expansion_tokens, d_model)
    ref = _ref_forward(frame_features, exp_tokens, layer_params, nhead)

    # Exact path (f32 MXU inputs, exact reciprocal): tight check vs. reference.
    out_exact = temporal_encoder_forward(
        frame_features, exp_tokens, layer_params, nhead, fast_math=False)
    out_exact = jax.block_until_ready(out_exact)
    assert out_exact.shape == expected_shape, out_exact.shape
    assert bool(jnp.all(jnp.isfinite(out_exact)))
    assert bool(jnp.allclose(out_exact, ref, atol=5e-4, rtol=5e-4)), (
        float(jnp.max(jnp.abs(out_exact - ref))))

    # Fast path (bf16 MXU inputs + approx reciprocal): looser tolerance.
    out_fast = temporal_encoder_forward(
        frame_features, exp_tokens, layer_params, nhead, fast_math=True)
    out_fast = jax.block_until_ready(out_fast)
    assert out_fast.shape == expected_shape, out_fast.shape
    assert bool(jnp.all(jnp.isfinite(out_fast)))
    assert bool(jnp.allclose(out_fast, ref, atol=5e-2, rtol=5e-2)), (
        float(jnp.max(jnp.abs(out_fast - ref))))

    print("KERNEL_OK")
</pallas_src>

<mosaic_0001>
module attributes {stable_mosaic.version = 11 : i64} {
  func.func @_temporal_encoder_kernel(%arg0: i32, %arg1: i32, %arg2: memref<2x10x32xf32, #tpu.memory_space<vmem>>, %arg3: memref<1x3x32x32xf32, #tpu.memory_space<vmem>>, %arg4: memref<1x32x32xf32, #tpu.memory_space<vmem>>, %arg5: memref<1x32x64xf32, #tpu.memory_space<vmem>>, %arg6: memref<1x64x32xf32, #tpu.memory_space<vmem>>, %arg7: memref<1x9x32xf32, #tpu.memory_space<vmem>>, %arg8: memref<1x1x64xf32, #tpu.memory_space<vmem>>, %arg9: memref<2x10x32xf32, #tpu.memory_space<vmem>>, %arg10: memref<20x32xf32, #tpu.memory_space<vmem>>) attributes {dimension_semantics = [#tpu.dimension_semantics<parallel>, #tpu.dimension_semantics<arbitrary>], iteration_bounds = array<i64: 1, 2>, scalar_prefetch = 0 : i64, scratch_operands = 1 : i64, tpu.core_type = #tpu.core_type<tc>, window_params = [{transform_indices = @transform_0, window_bounds = array<i64: 2, 10, 32>}, {transform_indices = @transform_1, window_bounds = array<i64: 1, 3, 32, 32>}, {transform_indices = @transform_2, window_bounds = array<i64: 1, 32, 32>}, {transform_indices = @transform_3, window_bounds = array<i64: 1, 32, 64>}, {transform_indices = @transform_4, window_bounds = array<i64: 1, 64, 32>}, {transform_indices = @transform_5, window_bounds = array<i64: 1, 9, 32>}, {transform_indices = @transform_6, window_bounds = array<i64: 1, 1, 64>}, {transform_indices = @transform_7, window_bounds = array<i64: 2, 10, 32>}]} {
    %c0_i32 = arith.constant 0 : i32
    %0 = arith.cmpi eq, %arg1, %c0_i32 : i32
    %1 = arith.extui %0 : i1 to i32
    %c0_i32_0 = arith.constant 0 : i32
    %2 = arith.cmpi ne, %1, %c0_i32_0 : i32
    scf.if %2 {
      %c0_62 = arith.constant 0 : index
      %c0_63 = arith.constant 0 : index
      %c0_64 = arith.constant 0 : index
      %176 = vector.load %arg2[%c0_62, %c0_63, %c0_64] : memref<2x10x32xf32, #tpu.memory_space<vmem>>, vector<2x10x32xf32>
      %177 = vector.shape_cast %176 : vector<2x10x32xf32> to vector<20x32xf32>
      %c0_65 = arith.constant 0 : index
      %c0_66 = arith.constant 0 : index
      %178 = vector.load %arg10[%c0_65, %c0_66] : memref<20x32xf32, #tpu.memory_space<vmem>>, vector<20x32xf32>
      tpu.vector_store %arg10[%c0_65, %c0_66], %177 {strides = array<i32>} : memref<20x32xf32, #tpu.memory_space<vmem>>, vector<20x32xf32>,
    } else {
    }
    %c0 = arith.constant 0 : index
    %c0_1 = arith.constant 0 : index
    %3 = vector.load %arg10[%c0, %c0_1] : memref<20x32xf32, #tpu.memory_space<vmem>>, vector<20x32xf32>
    %c0_2 = arith.constant 0 : index
    %c0_3 = arith.constant 0 : index
    %c0_4 = arith.constant 0 : index
    %4 = vector.load %arg7[%c0_2, %c0_3, %c0_4] : memref<1x9x32xf32, #tpu.memory_space<vmem>>, vector<1x9x32xf32>
    %5 = vector.shape_cast %4 : vector<1x9x32xf32> to vector<9x32xf32>
    %6 = vector.extract_strided_slice %5 {offsets = [0, 0], sizes = [1, 32], strides = [1, 1]} : vector<9x32xf32> to vector<1x32xf32>
    %7 = vector.extract_strided_slice %5 {offsets = [1, 0], sizes = [1, 32], strides = [1, 1]} : vector<9x32xf32> to vector<1x32xf32>
    %8 = vector.extract_strided_slice %5 {offsets = [2, 0], sizes = [1, 32], strides = [1, 1]} : vector<9x32xf32> to vector<1x32xf32>
    %9 = vector.extract_strided_slice %5 {offsets = [3, 0], sizes = [1, 32], strides = [1, 1]} : vector<9x32xf32> to vector<1x32xf32>
    %10 = vector.extract_strided_slice %5 {offsets = [4, 0], sizes = [1, 32], strides = [1, 1]} : vector<9x32xf32> to vector<1x32xf32>
    %11 = vector.extract_strided_slice %5 {offsets = [5, 0], sizes = [1, 32], strides = [1, 1]} : vector<9x32xf32> to vector<1x32xf32>
    %12 = vector.extract_strided_slice %5 {offsets = [6, 0], sizes = [1, 32], strides = [1, 1]} : vector<9x32xf32> to vector<1x32xf32>
    %13 = vector.extract_strided_slice %5 {offsets = [7, 0], sizes = [1, 32], strides = [1, 1]} : vector<9x32xf32> to vector<1x32xf32>
    %14 = vector.extract_strided_slice %5 {offsets = [8, 0], sizes = [1, 32], strides = [1, 1]} : vector<9x32xf32> to vector<1x32xf32>
    %c0_5 = arith.constant 0 : index
    %c0_6 = arith.constant 0 : index
    %c0_7 = arith.constant 0 : index
    %c0_8 = arith.constant 0 : index
    %15 = vector.load %arg3[%c0_5, %c0_6, %c0_7, %c0_8] : memref<1x3x32x32xf32, #tpu.memory_space<vmem>>, vector<1x1x32x32xf32>
    %16 = vector.shape_cast %15 : vector<1x1x32x32xf32> to vector<32x32xf32>
    %cst = arith.constant dense<0.000000e+00> : vector<20x32xf32>
    %17 = tpu.matmul %3, %16, %cst {dimension_numbers = #tpu.dot_dimension_numbers<[1], [0], [0], [1], [0, 0, 1, 1], [], []>} : vector<20x32xf32>, vector<32x32xf32>, vector<20x32xf32> -> vector<20x32xf32>
    %18 = vector.broadcast %6 : vector<1x32xf32> to vector<20x32xf32>
    %19 = arith.addf %17, %18 : vector<20x32xf32>
    %c0_9 = arith.constant 0 : index
    %c1 = arith.constant 1 : index
    %c0_10 = arith.constant 0 : index
    %c0_11 = arith.constant 0 : index
    %20 = vector.load %arg3[%c0_9, %c1, %c0_10, %c0_11] : memref<1x3x32x32xf32, #tpu.memory_space<vmem>>, vector<1x1x32x32xf32>
    %21 = vector.shape_cast %20 : vector<1x1x32x32xf32> to vector<32x32xf32>
    %cst_12 = arith.constant dense<0.000000e+00> : vector<20x32xf32>
    %22 = tpu.matmul %3, %21, %cst_12 {dimension_numbers = #tpu.dot_dimension_numbers<[1], [0], [0], [1], [0, 0, 1, 1], [], []>} : vector<20x32xf32>, vector<32x32xf32>, vector<20x32xf32> -> vector<20x32xf32>
    %23 = vector.broadcast %7 : vector<1x32xf32> to vector<20x32xf32>
    %24 = arith.addf %22, %23 : vector<20x32xf32>
    %c0_13 = arith.constant 0 : index
    %c2 = arith.constant 2 : index
    %c0_14 = arith.constant 0 : index
    %c0_15 = arith.constant 0 : index
    %25 = vector.load %arg3[%c0_13, %c2, %c0_14, %c0_15] : memref<1x3x32x32xf32, #tpu.memory_space<vmem>>, vector<1x1x32x32xf32>
    %26 = vector.shape_cast %25 : vector<1x1x32x32xf32> to vector<32x32xf32>
    %cst_16 = arith.constant dense<0.000000e+00> : vector<20x32xf32>
    %27 = tpu.matmul %3, %26, %cst_16 {dimension_numbers = #tpu.dot_dimension_numbers<[1], [0], [0], [1], [0, 0, 1, 1], [], []>} : vector<20x32xf32>, vector<32x32xf32>, vector<20x32xf32> -> vector<20x32xf32>
    %28 = vector.broadcast %8 : vector<1x32xf32> to vector<20x32xf32>
    %29 = arith.addf %27, %28 : vector<20x32xf32>
    %30 = vector.extract_strided_slice %19 {offsets = [0, 0], sizes = [20, 8], strides = [1, 1]} : vector<20x32xf32> to vector<20x8xf32>
    %31 = vector.shape_cast %30 : vector<20x8xf32> to vector<2x10x8xf32>
    %32 = vector.extract_strided_slice %24 {offsets = [0, 0], sizes = [20, 8], strides = [1, 1]} : vector<20x32xf32> to vector<20x8xf32>
    %33 = vector.shape_cast %32 : vector<20x8xf32> to vector<2x10x8xf32>
    %34 = vector.extract_strided_slice %29 {offsets = [0, 0], sizes = [20, 8], strides = [1, 1]} : vector<20x32xf32> to vector<20x8xf32>
    %35 = vector.shape_cast %34 : vector<20x8xf32> to vector<2x10x8xf32>
    "tpu.trace_start"() <{level = 10 : i32, message = "bqe,bke->bqk"}> : () -> ()
    %cst_17 = arith.constant dense<0.000000e+00> : vector<2x10x10xf32>
    %36 = tpu.matmul %31, %33, %cst_17 {dimension_numbers = #tpu.dot_dimension_numbers<[2], [2], [1], [1], [0, 0, 0, 1, 1, 1], [0], [0]>} : vector<2x10x8xf32>, vector<2x10x8xf32>, vector<2x10x10xf32> -> vector<2x10x10xf32>
    "tpu.trace_stop"() : () -> ()
    %cst_18 = arith.constant dense<0xFF800000> : vector<2x10xf32>
    %37 = vector.multi_reduction <maximumf>, %36, %cst_18 [2] : vector<2x10x10xf32> to vector<2x10xf32>
    %38 = vector.shape_cast %37 : vector<2x10xf32> to vector<2x10x1xf32>
    %39 = vector.broadcast %38 : vector<2x10x1xf32> to vector<2x10x10xf32>
    %40 = arith.subf %36, %39 : vector<2x10x10xf32>
    %41 = math.exp %40 : vector<2x10x10xf32>
    %cst_19 = arith.constant dense<0.000000e+00> : vector<2x10xf32>
    %42 = vector.multi_reduction <add>, %41, %cst_19 [2] : vector<2x10x10xf32> to vector<2x10xf32>
    %43 = vector.shape_cast %42 : vector<2x10xf32> to vector<2x10x1xf32>
    %44 = tpu.reciprocal %43 : vector<2x10x1xf32> -> vector<2x10x1xf32>
    %45 = vector.broadcast %44 : vector<2x10x1xf32> to vector<2x10x10xf32>
    %46 = arith.mulf %41, %45 : vector<2x10x10xf32>
    "tpu.trace_start"() <{level = 10 : i32, message = "bqk,bke->bqe"}> : () -> ()
    %cst_20 = arith.constant dense<0.000000e+00> : vector<2x10x8xf32>
    %47 = tpu.matmul %46, %35, %cst_20 {dimension_numbers = #tpu.dot_dimension_numbers<[2], [1], [1], [2], [0, 0, 0, 1, 1, 2], [0], [0]>} : vector<2x10x10xf32>, vector<2x10x8xf32>, vector<2x10x8xf32> -> vector<2x10x8xf32>
    "tpu.trace_stop"() : () -> ()
    %48 = vector.shape_cast %47 : vector<2x10x8xf32> to vector<20x8xf32>
    %49 = vector.extract_strided_slice %19 {offsets = [0, 8], sizes = [20, 8], strides = [1, 1]} : vector<20x32xf32> to vector<20x8xf32>
    %50 = vector.shape_cast %49 : vector<20x8xf32> to vector<2x10x8xf32>
    %51 = vector.extract_strided_slice %24 {offsets = [0, 8], sizes = [20, 8], strides = [1, 1]} : vector<20x32xf32> to vector<20x8xf32>
    %52 = vector.shape_cast %51 : vector<20x8xf32> to vector<2x10x8xf32>
    %53 = vector.extract_strided_slice %29 {offsets = [0, 8], sizes = [20, 8], strides = [1, 1]} : vector<20x32xf32> to vector<20x8xf32>
    %54 = vector.shape_cast %53 : vector<20x8xf32> to vector<2x10x8xf32>
    "tpu.trace_start"() <{level = 10 : i32, message = "bqe,bke->bqk"}> : () -> ()
    %cst_21 = arith.constant dense<0.000000e+00> : vector<2x10x10xf32>
    %55 = tpu.matmul %50, %52, %cst_21 {dimension_numbers = #tpu.dot_dimension_numbers<[2], [2], [1], [1], [0, 0, 0, 1, 1, 1], [0], [0]>} : vector<2x10x8xf32>, vector<2x10x8xf32>, vector<2x10x10xf32> -> vector<2x10x10xf32>
    "tpu.trace_stop"() : () -> ()
    %cst_22 = arith.constant dense<0xFF800000> : vector<2x10xf32>
    %56 = vector.multi_reduction <maximumf>, %55, %cst_22 [2] : vector<2x10x10xf32> to vector<2x10xf32>
    %57 = vector.shape_cast %56 : vector<2x10xf32> to vector<2x10x1xf32>
    %58 = vector.broadcast %57 : vector<2x10x1xf32> to vector<2x10x10xf32>
    %59 = arith.subf %55, %58 : vector<2x10x10xf32>
    %60 = math.exp %59 : vector<2x10x10xf32>
    %cst_23 = arith.constant dense<0.000000e+00> : vector<2x10xf32>
    %61 = vector.multi_reduction <add>, %60, %cst_23 [2] : vector<2x10x10xf32> to vector<2x10xf32>
    %62 = vector.shape_cast %61 : vector<2x10xf32> to vector<2x10x1xf32>
    %63 = tpu.reciprocal %62 : vector<2x10x1xf32> -> vector<2x10x1xf32>
    %64 = vector.broadcast %63 : vector<2x10x1xf32> to vector<2x10x10xf32>
    %65 = arith.mulf %60, %64 : vector<2x10x10xf32>
    "tpu.trace_start"() <{level = 10 : i32, message = "bqk,bke->bqe"}> : () -> ()
    %cst_24 = arith.constant dense<0.000000e+00> : vector<2x10x8xf32>
    %66 = tpu.matmul %65, %54, %cst_24 {dimension_numbers = #tpu.dot_dimension_numbers<[2], [1], [1], [2], [0, 0, 0, 1, 1, 2], [0], [0]>} : vector<2x10x10xf32>, vector<2x10x8xf32>, vector<2x10x8xf32> -> vector<2x10x8xf32>
    "tpu.trace_stop"() : () -> ()
    %67 = vector.shape_cast %66 : vector<2x10x8xf32> to vector<20x8xf32>
    %68 = vector.extract_strided_slice %19 {offsets = [0, 16], sizes = [20, 8], strides = [1, 1]} : vector<20x32xf32> to vector<20x8xf32>
    %69 = vector.shape_cast %68 : vector<20x8xf32> to vector<2x10x8xf32>
    %70 = vector.extract_strided_slice %24 {offsets = [0, 16], sizes = [20, 8], strides = [1, 1]} : vector<20x32xf32> to vector<20x8xf32>
    %71 = vector.shape_cast %70 : vector<20x8xf32> to vector<2x10x8xf32>
    %72 = vector.extract_strided_slice %29 {offsets = [0, 16], sizes = [20, 8], strides = [1, 1]} : vector<20x32xf32> to vector<20x8xf32>
    %73 = vector.shape_cast %72 : vector<20x8xf32> to vector<2x10x8xf32>
    "tpu.trace_start"() <{level = 10 : i32, message = "bqe,bke->bqk"}> : () -> ()
    %cst_25 = arith.constant dense<0.000000e+00> : vector<2x10x10xf32>
    %74 = tpu.matmul %69, %71, %cst_25 {dimension_numbers = #tpu.dot_dimension_numbers<[2], [2], [1], [1], [0, 0, 0, 1, 1, 1], [0], [0]>} : vector<2x10x8xf32>, vector<2x10x8xf32>, vector<2x10x10xf32> -> vector<2x10x10xf32>
    "tpu.trace_stop"() : () -> ()
    %cst_26 = arith.constant dense<0xFF800000> : vector<2x10xf32>
    %75 = vector.multi_reduction <maximumf>, %74, %cst_26 [2] : vector<2x10x10xf32> to vector<2x10xf32>
    %76 = vector.shape_cast %75 : vector<2x10xf32> to vector<2x10x1xf32>
    %77 = vector.broadcast %76 : vector<2x10x1xf32> to vector<2x10x10xf32>
    %78 = arith.subf %74, %77 : vector<2x10x10xf32>
    %79 = math.exp %78 : vector<2x10x10xf32>
    %cst_27 = arith.constant dense<0.000000e+00> : vector<2x10xf32>
    %80 = vector.multi_reduction <add>, %79, %cst_27 [2] : vector<2x10x10xf32> to vector<2x10xf32>
    %81 = vector.shape_cast %80 : vector<2x10xf32> to vector<2x10x1xf32>
    %82 = tpu.reciprocal %81 : vector<2x10x1xf32> -> vector<2x10x1xf32>
    %83 = vector.broadcast %82 : vector<2x10x1xf32> to vector<2x10x10xf32>
    %84 = arith.mulf %79, %83 : vector<2x10x10xf32>
    "tpu.trace_start"() <{level = 10 : i32, message = "bqk,bke->bqe"}> : () -> ()
    %cst_28 = arith.constant dense<0.000000e+00> : vector<2x10x8xf32>
    %85 = tpu.matmul %84, %73, %cst_28 {dimension_numbers = #tpu.dot_dimension_numbers<[2], [1], [1], [2], [0, 0, 0, 1, 1, 2], [0], [0]>} : vector<2x10x10xf32>, vector<2x10x8xf32>, vector<2x10x8xf32> -> vector<2x10x8xf32>
    "tpu.trace_stop"() : () -> ()
    %86 = vector.shape_cast %85 : vector<2x10x8xf32> to vector<20x8xf32>
    %87 = vector.extract_strided_slice %19 {offsets = [0, 24], sizes = [20, 8], strides = [1, 1]} : vector<20x32xf32> to vector<20x8xf32>
    %88 = vector.shape_cast %87 : vector<20x8xf32> to vector<2x10x8xf32>
    %89 = vector.extract_strided_slice %24 {offsets = [0, 24], sizes = [20, 8], strides = [1, 1]} : vector<20x32xf32> to vector<20x8xf32>
    %90 = vector.shape_cast %89 : vector<20x8xf32> to vector<2x10x8xf32>
    %91 = vector.extract_strided_slice %29 {offsets = [0, 24], sizes = [20, 8], strides = [1, 1]} : vector<20x32xf32> to vector<20x8xf32>
    %92 = vector.shape_cast %91 : vector<20x8xf32> to vector<2x10x8xf32>
    "tpu.trace_start"() <{level = 10 : i32, message = "bqe,bke->bqk"}> : () -> ()
    %cst_29 = arith.constant dense<0.000000e+00> : vector<2x10x10xf32>
    %93 = tpu.matmul %88, %90, %cst_29 {dimension_numbers = #tpu.dot_dimension_numbers<[2], [2], [1], [1], [0, 0, 0, 1, 1, 1], [0], [0]>} : vector<2x10x8xf32>, vector<2x10x8xf32>, vector<2x10x10xf32> -> vector<2x10x10xf32>
    "tpu.trace_stop"() : () -> ()
    %cst_30 = arith.constant dense<0xFF800000> : vector<2x10xf32>
    %94 = vector.multi_reduction <maximumf>, %93, %cst_30 [2] : vector<2x10x10xf32> to vector<2x10xf32>
    %95 = vector.shape_cast %94 : vector<2x10xf32> to vector<2x10x1xf32>
    %96 = vector.broadcast %95 : vector<2x10x1xf32> to vector<2x10x10xf32>
    %97 = arith.subf %93, %96 : vector<2x10x10xf32>
    %98 = math.exp %97 : vector<2x10x10xf32>
    %cst_31 = arith.constant dense<0.000000e+00> : vector<2x10xf32>
    %99 = vector.multi_reduction <add>, %98, %cst_31 [2] : vector<2x10x10xf32> to vector<2x10xf32>
    %100 = vector.shape_cast %99 : vector<2x10xf32> to vector<2x10x1xf32>
    %101 = tpu.reciprocal %100 : vector<2x10x1xf32> -> vector<2x10x1xf32>
    %102 = vector.broadcast %101 : vector<2x10x1xf32> to vector<2x10x10xf32>
    %103 = arith.mulf %98, %102 : vector<2x10x10xf32>
    "tpu.trace_start"() <{level = 10 : i32, message = "bqk,bke->bqe"}> : () -> ()
    %cst_32 = arith.constant dense<0.000000e+00> : vector<2x10x8xf32>
    %104 = tpu.matmul %103, %92, %cst_32 {dimension_numbers = #tpu.dot_dimension_numbers<[2], [1], [1], [2], [0, 0, 0, 1, 1, 2], [0], [0]>} : vector<2x10x10xf32>, vector<2x10x8xf32>, vector<2x10x8xf32> -> vector<2x10x8xf32>
    "tpu.trace_stop"() : () -> ()
    %105 = vector.shape_cast %104 : vector<2x10x8xf32> to vector<20x8xf32>
    %106 = tpu.concatenate %48, %67, %86, %105 in 1 : vector<20x8xf32>, vector<20x8xf32>, vector<20x8xf32>, vector<20x8xf32> -> vector<20x32xf32>
    %c0_33 = arith.constant 0 : index
    %c0_34 = arith.constant 0 : index
    %c0_35 = arith.constant 0 : index
    %107 = vector.load %arg4[%c0_33, %c0_34, %c0_35] : memref<1x32x32xf32, #tpu.memory_space<vmem>>, vector<1x32x32xf32>
    %108 = vector.shape_cast %107 : vector<1x32x32xf32> to vector<32x32xf32>
    %cst_36 = arith.constant dense<0.000000e+00> : vector<20x32xf32>
    %109 = tpu.matmul %106, %108, %cst_36 {dimension_numbers = #tpu.dot_dimension_numbers<[1], [0], [0], [1], [0, 0, 1, 1], [], []>} : vector<20x32xf32>, vector<32x32xf32>, vector<20x32xf32> -> vector<20x32xf32>
    %110 = vector.broadcast %9 : vector<1x32xf32> to vector<20x32xf32>
    %111 = arith.addf %109, %110 : vector<20x32xf32>
    %112 = arith.addf %3, %111 : vector<20x32xf32>
    %cst_37 = arith.constant dense<0.000000e+00> : vector<20xf32>
    %113 = vector.multi_reduction <add>, %112, %cst_37 [1] : vector<20x32xf32> to vector<20xf32>
    %114 = vector.shape_cast %113 : vector<20xf32> to vector<20x1xf32>
    %cst_38 = arith.constant 3.200000e+01 : f32
    %115 = vector.broadcast %cst_38 : f32 to vector<20x1xf32>
    %116 = arith.divf %114, %115 : vector<20x1xf32>
    %117 = vector.broadcast %116 : vector<20x1xf32> to vector<20x32xf32>
    %118 = arith.subf %112, %117 : vector<20x32xf32>
    %119 = arith.mulf %118, %118 : vector<20x32xf32>
    %cst_39 = arith.constant dense<0.000000e+00> : vector<20xf32>
    %120 = vector.multi_reduction <add>, %119, %cst_39 [1] : vector<20x32xf32> to vector<20xf32>
    %121 = vector.shape_cast %120 : vector<20xf32> to vector<20x1xf32>
    %cst_40 = arith.constant 3.200000e+01 : f32
    %122 = vector.broadcast %cst_40 : f32 to vector<20x1xf32>
    %123 = arith.divf %121, %122 : vector<20x1xf32>
    %124 = vector.broadcast %116 : vector<20x1xf32> to vector<20x32xf32>
    %125 = arith.subf %112, %124 : vector<20x32xf32>
    %cst_41 = arith.constant 9.99999974E-6 : f32
    %126 = vector.broadcast %cst_41 : f32 to vector<20x1xf32>
    %127 = arith.addf %123, %126 : vector<20x1xf32>
    %128 = math.rsqrt %127 : vector<20x1xf32>
    %129 = vector.broadcast %128 : vector<20x1xf32> to vector<20x32xf32>
    %130 = arith.mulf %125, %129 : vector<20x32xf32>
    %131 = vector.broadcast %10 : vector<1x32xf32> to vector<20x32xf32>
    %132 = arith.mulf %130, %131 : vector<20x32xf32>
    %133 = vector.broadcast %11 : vector<1x32xf32> to vector<20x32xf32>
    %134 = arith.addf %132, %133 : vector<20x32xf32>
    %c0_42 = arith.constant 0 : index
    %c0_43 = arith.constant 0 : index
    %c0_44 = arith.constant 0 : index
    %135 = vector.load %arg5[%c0_42, %c0_43, %c0_44] : memref<1x32x64xf32, #tpu.memory_space<vmem>>, vector<1x32x64xf32>
    %136 = vector.shape_cast %135 : vector<1x32x64xf32> to vector<32x64xf32>
    %cst_45 = arith.constant dense<0.000000e+00> : vector<20x64xf32>
    %137 = tpu.matmul %134, %136, %cst_45 {dimension_numbers = #tpu.dot_dimension_numbers<[1], [0], [0], [1], [0, 0, 1, 1], [], []>} : vector<20x32xf32>, vector<32x64xf32>, vector<20x64xf32> -> vector<20x64xf32>
    %c0_46 = arith.constant 0 : index
    %c0_47 = arith.constant 0 : index
    %c0_48 = arith.constant 0 : index
    %138 = vector.load %arg8[%c0_46, %c0_47, %c0_48] : memref<1x1x64xf32, #tpu.memory_space<vmem>>, vector<1x1x64xf32>
    %139 = vector.shape_cast %138 : vector<1x1x64xf32> to vector<1x64xf32>
    %140 = vector.broadcast %139 : vector<1x64xf32> to vector<20x64xf32>
    %141 = arith.addf %137, %140 : vector<20x64xf32>
    %cst_49 = arith.constant 0.000000e+00 : f32
    %142 = vector.broadcast %cst_49 : f32 to vector<20x64xf32>
    %143 = arith.maximumf %141, %142 : vector<20x64xf32>
    %c0_50 = arith.constant 0 : index
    %c0_51 = arith.constant 0 : index
    %c0_52 = arith.constant 0 : index
    %144 = vector.load %arg6[%c0_50, %c0_51, %c0_52] : memref<1x64x32xf32, #tpu.memory_space<vmem>>, vector<1x64x32xf32>
    %145 = vector.shape_cast %144 : vector<1x64x32xf32> to vector<64x32xf32>
    %cst_53 = arith.constant dense<0.000000e+00> : vector<20x32xf32>
    %146 = tpu.matmul %143, %145, %cst_53 {dimension_numbers = #tpu.dot_dimension_numbers<[1], [0], [0], [1], [0, 0, 1, 1], [], []>} : vector<20x64xf32>, vector<64x32xf32>, vector<20x32xf32> -> vector<20x32xf32>
    %147 = vector.broadcast %12 : vector<1x32xf32> to vector<20x32xf32>
    %148 = arith.addf %146, %147 : vector<20x32xf32>
    %149 = arith.addf %134, %148 : vector<20x32xf32>
    %cst_54 = arith.constant dense<0.000000e+00> : vector<20xf32>
    %150 = vector.multi_reduction <add>, %149, %cst_54 [1] : vector<20x32xf32> to vector<20xf32>
    %151 = vector.shape_cast %150 : vector<20xf32> to vector<20x1xf32>
    %cst_55 = arith.constant 3.200000e+01 : f32
    %152 = vector.broadcast %cst_55 : f32 to vector<20x1xf32>
    %153 = arith.divf %151, %152 : vector<20x1xf32>
    %154 = vector.broadcast %153 : vector<20x1xf32> to vector<20x32xf32>
    %155 = arith.subf %149, %154 : vector<20x32xf32>
    %156 = arith.mulf %155, %155 : vector<20x32xf32>
    %cst_56 = arith.constant dense<0.000000e+00> : vector<20xf32>
    %157 = vector.multi_reduction <add>, %156, %cst_56 [1] : vector<20x32xf32> to vector<20xf32>
    %158 = vector.shape_cast %157 : vector<20xf32> to vector<20x1xf32>
    %cst_57 = arith.constant 3.200000e+01 : f32
    %159 = vector.broadcast %cst_57 : f32 to vector<20x1xf32>
    %160 = arith.divf %158, %159 : vector<20x1xf32>
    %161 = vector.broadcast %153 : vector<20x1xf32> to vector<20x32xf32>
    %162 = arith.subf %149, %161 : vector<20x32xf32>
    %cst_58 = arith.constant 9.99999974E-6 : f32
    %163 = vector.broadcast %cst_58 : f32 to vector<20x1xf32>
    %164 = arith.addf %160, %163 : vector<20x1xf32>
    %165 = math.rsqrt %164 : vector<20x1xf32>
    %166 = vector.broadcast %165 : vector<20x1xf32> to vector<20x32xf32>
    %167 = arith.mulf %162, %166 : vector<20x32xf32>
    %168 = vector.broadcast %13 : vector<1x32xf32> to vector<20x32xf32>
    %169 = arith.mulf %167, %168 : vector<20x32xf32>
    %170 = vector.broadcast %14 : vector<1x32xf32> to vector<20x32xf32>
    %171 = arith.addf %169, %170 : vector<20x32xf32>
    %c0_59 = arith.constant 0 : index
    %c0_60 = arith.constant 0 : index
    %172 = vector.load %arg10[%c0_59, %c0_60] : memref<20x32xf32, #tpu.memory_space<vmem>>, vector<20x32xf32>
    tpu.vector_store %arg10[%c0_59, %c0_60], %171 {strides = array<i32>} : memref<20x32xf32, #tpu.memory_space<vmem>>, vector<20x32xf32>,
    %c1_i32 = arith.constant 1 : i32
    %173 = arith.cmpi eq, %arg1, %c1_i32 : i32
    %174 = arith.extui %173 : i1 to i32
    %c0_i32_61 = arith.constant 0 : i32
    %175 = arith.cmpi ne, %174, %c0_i32_61 : i32
    scf.if %175 {
      %176 = vector.shape_cast %171 : vector<20x32xf32> to vector<2x10x32xf32>
      %c0_62 = arith.constant 0 : index
      %c0_63 = arith.constant 0 : index
      %c0_64 = arith.constant 0 : index
      %177 = vector.load %arg9[%c0_62, %c0_63, %c0_64] : memref<2x10x32xf32, #tpu.memory_space<vmem>>, vector<2x10x32xf32>
      tpu.vector_store %arg9[%c0_62, %c0_63, %c0_64], %176 {strides = array<i32>} : memref<2x10x32xf32, #tpu.memory_space<vmem>>, vector<2x10x32xf32>,
    } else {
    }
    return
  }
  func.func @transform_0(%arg0: i32, %arg1: i32) -> (i32, i32, i32) {
    %c0_i32 = arith.constant 0 : i32
    %c0_i32_0 = arith.constant 0 : i32
    %c0_i32_1 = arith.constant 0 : i32
    return %arg0, %c0_i32, %c0_i32_0 : i32, i32, i32
  }
  func.func @transform_1(%arg0: i32, %arg1: i32) -> (i32, i32, i32, i32) {
    %c0_i32 = arith.constant 0 : i32
    %c0_i32_0 = arith.constant 0 : i32
    %c0_i32_1 = arith.constant 0 : i32
    %c0_i32_2 = arith.constant 0 : i32
    return %arg1, %c0_i32, %c0_i32_0, %c0_i32_1 : i32, i32, i32, i32
  }
  func.func @transform_2(%arg0: i32, %arg1: i32) -> (i32, i32, i32) {
    %c0_i32 = arith.constant 0 : i32
    %c0_i32_0 = arith.constant 0 : i32
    %c0_i32_1 = arith.constant 0 : i32
    return %arg1, %c0_i32, %c0_i32_0 : i32, i32, i32
  }
  func.func @transform_3(%arg0: i32, %arg1: i32) -> (i32, i32, i32) {
    %c0_i32 = arith.constant 0 : i32
    %c0_i32_0 = arith.constant 0 : i32
    %c0_i32_1 = arith.constant 0 : i32
    return %arg1, %c0_i32, %c0_i32_0 : i32, i32, i32
  }
  func.func @transform_4(%arg0: i32, %arg1: i32) -> (i32, i32, i32) {
    %c0_i32 = arith.constant 0 : i32
    %c0_i32_0 = arith.constant 0 : i32
    %c0_i32_1 = arith.constant 0 : i32
    return %arg1, %c0_i32, %c0_i32_0 : i32, i32, i32
  }
  func.func @transform_5(%arg0: i32, %arg1: i32) -> (i32, i32, i32) {
    %c0_i32 = arith.constant 0 : i32
    %c0_i32_0 = arith.constant 0 : i32
    %c0_i32_1 = arith.constant 0 : i32
    return %arg1, %c0_i32, %c0_i32_0 : i32, i32, i32
  }
  func.func @transform_6(%arg0: i32, %arg1: i32) -> (i32, i32, i32) {
    %c0_i32 = arith.constant 0 : i32
    %c0_i32_0 = arith.constant 0 : i32
    %c0_i32_1 = arith.constant 0 : i32
    return %arg1, %c0_i32, %c0_i32_0 : i32, i32, i32
  }
  func.func @transform_7(%arg0: i32, %arg1: i32) -> (i32, i32, i32) {
    %c0_i32 = arith.constant 0 : i32
    %c0_i32_0 = arith.constant 0 : i32
    %c0_i32_1 = arith.constant 0 : i32
    return %arg0, %c0_i32, %c0_i32_0 : i32, i32, i32
  }
}

</mosaic_0001>

<bundles_post_ra>
// kernel: tpu_custom_call.1
= control target key start
LH: loop header
LB: loop body
LE: loop exit
PB: predicated region body
PF: predicated region fallthrough
CT: control target
= control target key end

     0   :  { %s5517_s0 = inlined_call_operand.vmem [shape: f32[2,10,32], index: 0, kind: input, shape index: {}]   ;;  %s5518_s1 = inlined_call_operand.vmem [shape: f32[2,3,32,32], index: 1, kind: input, shape index: {}]   ;;  %s5519_s2 = inlined_call_operand.hbm [shape: f32[2,32,32], index: 2, kind: input, shape index: {}]   ;;  %s5520_s3 = inlined_call_operand.hbm [shape: f32[2,32,64], index: 3, kind: input, shape index: {}]   ;;  %s5521_s4 = inlined_call_operand.vmem [shape: f32[2,64,32], index: 4, kind: input, shape index: {}]   ;;  %s5522_s5 = inlined_call_operand.vmem [shape: f32[2,9,32], index: 5, kind: input, shape index: {}]   ;;  %s5523_s6 = inlined_call_operand.vmem [shape: f32[2,1,64], index: 6, kind: input, shape index: {}]   ;;  %s5524_s7 = inlined_call_operand.vmem [shape: f32[2,10,32], index: 7, kind: output, shape index: {}]  }
   0x1   :  { %5527 = sst [smem:[#allocation9_spill]] %s5519_s2 }
   0x2   :  { %5528 = sst [smem:[#allocation10_spill]] %s5520_s3 }
   0x3   :  { %12 = vsyncpa [#allocation4], 0 }
   0x4   :  { %14 = vsyncpa [#allocation4 + $0x1], 0 }
   0x5   :  { %15 = vsyncpa [#allocation6], 0 }
   0x6   :  { %17 = vsyncpa [#allocation6 + $0x1], 0  ;;  %s4788_s24 = smov 0   ;;  %s4790_s25 = smov 0  }
   0x7   :  { %s4792_s26 = smov 0   ;;  %s4794_s27 = smov 0  }
   0x8   :  { %s4796_s28 = smov 0   ;;  %s4798_s29 = smov 0  }
   0x9 LB: > { %s3811_s30 = sadd.s32 4294967295, %s4730_s29   ;;  %s32_s8 = sadd.s32 1, %s4726_s28  ;;  %s4730_s29 = sphi %s4798_s29, %s23_s29   ;;  %s4726_s28 = sphi %s4796_s28, %s5545_s28   ;;  %s4722_s27 = sphi %s4794_s27, %s5544_s27   ;;  %s4718_s26 = sphi %s4792_s26, %s5543_s26   ;;  %s4714_s25 = sphi %s4790_s25, %s5542_s25   ;;  %s4710_s24 = sphi %s4788_s24, %s5541_s24  }
   0xa   : > { %p33_p0 = scmp.ge.s32.totalorder %s32_s8, 2  ;;  %s94_s9 = sadd.s32 1, %s4718_s26 }
   0xb   : > { %p101_p1 = scmp.ne.s32.totalorder %s4718_s26, %s4714_s25  ;;  %p102_p2 = scmp.eq.s32.totalorder %s4730_s29, 0 }
   0xc   : > { %s5547_s8 = smov (%p33_p0, %s32_s8), 0  ;;  %p107_p4 = scmp.ne.s32.totalorder %s4714_s25, %s4710_s24 }
   0xd   : > { %p4824_p3 = por %p102_p2, %p101_p1  ;;  %s91_s11 = ssub.s32 %s4726_s28, %s5547_s8 }
   0xe   : > { %p108_p5 = scmp.eq.s32.totalorder %s3811_s30, 0  ;;  %p92_p6 = scmp.eq.s32.totalorder %s91_s11, 0 }
   0xf   : > { %p4411_p8 = scmp.lt.s32.totalorder %s4730_s29, 2  ;;  %s4840_s14 = sand.u32 1, %s4718_s26  }
  0x10   : > { %p4831_p7 = por %p108_p5, %p107_p4  ;;  %s3921_s15 = sshll.u32 %s4726_s28, 9 }
  0x11   : > { %s4837_s13 = scalar_select %p92_p6, %s4718_s26, %s94_s9  }
  0x12   : > { %s5530_s12 = scalar_select %p4831_p7, 1, 0 }
  0x13   : > { %s3815_s16 = sshll.u32 %s4840_s14, 5  ;;  %s5531_s2 = sld [smem:[#allocation9_spill]] }
  0x14   : > { %s283_s20 = scalar_lea.vmem [#allocation3], %s3815_s16  ;;  %p4855_p9 = pnand %p4411_p8, %p4824_p3 }
  0x15   : > { %s290_s21 = sshll.u32 %s283_s20, 4  ;;  %s280_s23 = scalar_lea.sflag [#allocation4], %s4840_s14  ;;  %s4859_s21 = int_to_ptr.vmem [resolvable:$true] %s290_s21 }
  0x16   : > { %p4618_p11 = pneg %p4855_p9 }
  0x19   : > { %s4849_s19 = scalar_lea.hbm %s5531_s2, %s3921_s15  ;;  %s4621_s10 = scalar_lea.hbm %s5531_s2, 1024 }
  0x1a   : > { %s4616_s24 = scalar_lea.hbm %s4849_s19, 512  ;;  %p4622_p0 = scmp.lt.u32.totalorder %s4849_s19, %s5531_s2 }
  0x1b   : > { %p4617_p10 = scmp.ne.s32.totalorder %s4849_s19, %s4616_s24  ;;  %p4623_p1 = scmp.lt.u32.totalorder %s4621_s10, %s4616_s24 }
  0x1c   : > { %p4625_p3 = scmp.lt.u32.totalorder %s4616_s24, %s4849_s19 }
  0x1d   : > { %p4619_p12 = pnand %p4618_p11, %p4617_p10  ;;  %p4624_p2 = por %p4623_p1, %p4622_p0 }
  0x1f   : > { %p4620_p13 = pneg %p4619_p12  ;;  %p4626_p4 = por %p4625_p3, %p4624_p2 }
  0x21   : > { %p4627_p5 = pnand %p4626_p4, %p4620_p13 }
  0x23   : > { %4630 = shalt.err (!%p4627_p5)
}
  0x24   : > { %s4631_s18 = scalar_lea.vmem %s4859_s21, 512  ;;  %s4732_s20 = smov [#allocation3]  }
  0x25   : > { %p4632_p6 = scmp.ne.s32.totalorder %s4859_s21, %s4631_s18  ;;  %s4636_s30 = sshll.u32 %s4732_s20, 4  ;;  %s4637_s30 = int_to_ptr.vmem [resolvable:$false] %s4636_s30 }
  0x26   : > { %s4638_s9 = scalar_lea.vmem %s4637_s30, 1024  ;;  %p4639_p12 = scmp.lt.s32.totalorder %s4859_s21, %s4637_s30 }
  0x27   : > { %p4634_p8 = pnand %p4632_p6, %p4618_p11  ;;  %p4640_p0 = scmp.lt.s32.totalorder %s4638_s9, %s4631_s18 }
  0x29   : > { %p4635_p10 = pneg %p4634_p8  ;;  %p4641_p1 = por %p4640_p0, %p4639_p12 }
  0x2b   : > { %p4642_p2 = pnand %p4641_p1, %p4635_p10 }
  0x2d   : > { %4645 = shalt.err (!%p4642_p2)
}
  0x2e   : > { %s5525_s24 = smov 128   ;;  %s4734_s10 = smov 8  }
  0x2f   : > { %4407 = dma.hbm_to_vmem [thread:$0]  (!%p4855_p9), %s4849_s19, 512, %s4859_s21, %s280_s23, %s5525_s24, %s5525_s24, %s4734_s10  }
  0x30   : > { %p3821_p13 = scmp.ge.s32.totalorder %s4730_s29, 1  ;;  %p341_p3 = scmp.lt.s32.totalorder %s4730_s29, 3 }
  0x31   : > { %s5534_s3 = sld [smem:[#allocation10_spill]]  ;;  %s304_s30 = scalar_lea.vmem [#allocation5], %s3815_s16 }
  0x32   : > { %p4894_p4 = pnand %p3821_p13, %p341_p3  ;;  %s311_s9 = sshll.u32 %s304_s30, 4  ;;  %s4907_s9 = int_to_ptr.vmem [resolvable:$true] %s311_s9 }
  0x33   : > { %s301_s19 = scalar_lea.sflag [#allocation6], %s4840_s14 }
  0x37   : > { %s4903_s20 = scalar_lea.hbm %s5534_s3, %s3921_s15  ;;  %s4651_s15 = scalar_lea.hbm %s5534_s3, 1024 }
  0x38   : > { %s4646_s21 = scalar_lea.hbm %s4903_s20, 512  ;;  %p4652_p10 = scmp.lt.u32.totalorder %s4903_s20, %s5534_s3 }
  0x39   : > { %p4647_p5 = scmp.ne.s32.totalorder %s4903_s20, %s4646_s21  ;;  %p4653_p12 = scmp.lt.u32.totalorder %s4651_s15, %s4646_s21 }
  0x3a   : > { %p4655_p1 = scmp.lt.u32.totalorder %s4646_s21, %s4903_s20 }
  0x3b   : > { %p4649_p6 = pnand %p4647_p5, %p4618_p11  ;;  %p4654_p0 = por %p4653_p12, %p4652_p10 }
  0x3d   : > { %p4650_p8 = pneg %p4649_p6  ;;  %p4656_p2 = por %p4655_p1, %p4654_p0 }
  0x3f   : > { %p4657_p13 = pnand %p4656_p2, %p4650_p8 }
  0x41   : > { %4660 = shalt.err (!%p4657_p13)
}
  0x42   : > { %s4661_s16 = scalar_lea.vmem %s4907_s9, 512  ;;  %s4735_s30 = smov [#allocation5]  }
  0x43   : > { %p4662_p3 = scmp.ne.s32.totalorder %s4907_s9, %s4661_s16  ;;  %s4666_s23 = sshll.u32 %s4735_s30, 4  ;;  %s4667_s23 = int_to_ptr.vmem [resolvable:$false] %s4666_s23 }
  0x44   : > { %s4668_s24 = scalar_lea.vmem %s4667_s23, 1024  ;;  %p4669_p7 = scmp.lt.s32.totalorder %s4907_s9, %s4667_s23 }
  0x45   : > { %p4664_p5 = pnand %p4662_p3, %p4618_p11  ;;  %p4670_p10 = scmp.lt.s32.totalorder %s4668_s24, %s4661_s16 }
  0x47   : > { %p4665_p6 = pneg %p4664_p5  ;;  %p4671_p12 = por %p4670_p10, %p4669_p7 }
  0x49   : > { %p4672_p0 = pnand %p4671_p12, %p4665_p6 }
  0x4b   : > { %4675 = shalt.err (!%p4672_p0)
}
  0x4c   : > { %s5535_s21 = smov 128   ;;  %345 = sbr.rel (%p4894_p4) target bundleno = 4135 (0x1027), region = 48 }
  0x4d   : > { %4410 = dma.hbm_to_vmem [thread:$0]  (!%p4855_p9), %s4903_s20, 512, %s4907_s9, %s301_s19, %s5535_s21, %s5535_s21, %s4734_s10  }
  0x4e   : > { %s347_s17 = sand.u32 (!%p4894_p4), 1, %s4714_s25   ;;  %p5536_p7 = scmp.ne.s32.totalorder (!%p4894_p4), %s5530_s12, 0 }
  0x4f   : > { %s3822_s15 = sshll.u32 (!%p4894_p4), %s347_s17, 5  ;;  %s348_s18 = scalar_lea.sflag (!%p4894_p4), [#allocation4], %s347_s17 }
  0x50   : > { %s4941_s16 = scalar_lea.vmem (!%p4894_p4), [#allocation3], %s3822_s15 }
  0x53   : > { %4701 = dma.done.wait (%p5536_p7), %s348_s18, 512  }
  0x54   : > { %4703 = vsyncadd (%p5536_p7), %s348_s18, 4294966784  ;;  %s357_s14 = scalar_lea.sflag [#allocation6], %s347_s17  ;;  %s4947_s22 = scalar_lea.vmem [#allocation5], %s3822_s15 }
  0x55   : > { %4705 = dma.done.wait (%p5536_p7), %s357_s14, 512  }
  0x56   : > { %4707 = vsyncadd (%p5536_p7), %s357_s14, 4294966784  ;;  %p428_p9 = scmp.lt.s32.totalorder %s4722_s27, 1  ;;  %p3829_p11 = scmp.ne.s32.totalorder %s4722_s27, 0 }
  0x57   : > { %v457_v0 = vld [vmem:[%s5517_s0] sm:$0xff] (!%p3829_p11)  ;;  %v469_v1 = vlaneseq (!%p3829_p11)  ;;  %v459_v2 = vld [vmem:[%s5517_s0 + $0x10] sm:$0xff] (!%p3829_p11)  ;;  %v4736_v3 = vmov (!%p3829_p11), 1983009808   ;;  %vm561_vm0 = vcmask (!%p3829_p11), 257024   ;;  %vm558_vm1 = vcmask (!%p3829_p11), 261120  }
  0x58   : > { %s4955_s10 = scalar_select %p428_p9, %s4722_s27, 1 }
  0x59   : > { %456 = sbr.rel (%p3829_p11) target bundleno = 106 (0x6a), region = 60  ;;  %v467_v4 = vunpack.c.l.s4 (!%p3829_p11), %v4736_v3  ;;  %v470_v5 = vshrl.u32 (!%p3829_p11), %v469_v1, 7  ;;  %v465_v6 = vcombine.high (!%p3829_p11), %v457_v0, %v457_v0  ;;  %v489_v8 = vcombine.high (!%p3829_p11), %v459_v2, %v459_v2  ;;  %v3830_v10 = vld.sshfl [vmem:[%s5517_s0 + $0x8] sm:$0x3 pattern:$0x76325410] (!%p3829_p11) }
  0x5a   : > { %s4399_s11 = smul.u32 96, %s4955_s10  ;;  %s3923_s20 = sshll.u32 %s4955_s10, 6  ;;  %v3831_v19 = vld.sshfl [vmem:[%s5517_s0 + $0x18] sm:$0x3 pattern:$0x76325410] (!%p3829_p11) }
  0x5b   : > { %s4962_s30 = scalar_lea.vmem %s5521_s4, %s3923_s20  ;;  %s3924_s23 = sshll.u32 %s4955_s10, 4  ;;  %v468_v7 = vunpack.c.0.s8 (!%p3829_p11), %v467_v4 }
  0x5c   : > { %s4968_s21 = scalar_lea.vmem %s5518_s1, %s4399_s11  ;;  %s4973_s18 = scalar_lea.vmem %s5522_s5, %s3924_s23 }
  0x5d   : > { %s445_s3 = scalar_lea.vmem %s5523_s6, %s4955_s10  ;;  %v471_v9 = vsub.s32 (!%p3829_p11), %v468_v7, %v470_v5 }
  0x5f   : > { %v472_v11 = vrot.slane (!%p3829_p11), %v457_v0, %v471_v9  ;;  %v479_v12 = vrot.slane (!%p3829_p11), %v465_v6, %v471_v9  ;;  %v496_v13 = vrot.slane (!%p3829_p11), %v459_v2, %v471_v9  ;;  %v503_v14 = vrot.slane (!%p3829_p11), %v489_v8, %v471_v9 }
  0x61   : > { %v480_v15 = vcombine.high %v472_v11, %v472_v11  ;;  %v481_v16 = vcombine.high %v479_v12, %v479_v12  ;;  %v504_v17 = vcombine.high %v496_v13, %v496_v13  ;;  %v530_v18 = vcombine.low %v3830_v10, %v496_v13 }
  0x62   : > { %v505_v20 = vcombine.high %v503_v14, %v503_v14 }
  0x63   : > { %v513_v21 = vcombine.low %v472_v11, %v480_v15  ;;  %v514_v22 = vcombine.low %v479_v12, %v481_v16  ;;  %v531_v23 = vcombine.low %v504_v17, %v503_v14  ;;  %v538_v24 = vrot.slane %v530_v18, %v471_v9 }
  0x64   : > { %v547_v25 = vcombine.low %v505_v20, %v3831_v19 }
  0x65   : > { %v521_v26 = vrot.slane %v513_v21, %v471_v9  ;;  %v528_v27 = vrot.slane %v514_v22, %v471_v9  ;;  %v545_v28 = vrot.slane %v531_v23, %v471_v9 }
  0x66   : > { %v554_v29 = vrot.slane %v547_v25, %v471_v9 }
  0x67   : > { %v529_v30 = vcombine.low %v521_v26, %v528_v27  ;;  %v546_v31 = vcombine.low %v538_v24, %v545_v28 }
  0x68   : > { %562 = vst.msk [vmem:[#allocation2 + $0x10] sm:$0xf] %vm561_vm0, %v554_v29 }
  0x69   : > { %559 = vst.msk [vmem:[#allocation2] sm:$0xff] %vm558_vm1, %v529_v30  ;;  %560 = vst.msk [vmem:[#allocation2 + $0x8] sm:$0xff] %vm558_vm1, %v546_v31 }
  0x6a PF: > { %v3835_v32 = vld [vmem:[%s4968_s21 + $0x20] sm:$0xff]  ;;  %v3836_v33 = vld [vmem:[%s4968_s21 + $0x28] sm:$0xff]  ;;  %v3837_v34 = vld [vmem:[%s4968_s21 + $0x30] sm:$0xff]  ;;  %v4737_v35 = vmov 0.0|0.0   ;;  %vm4738_vm2 = vmmov 0   ;;  %v4739_v41 = vmov 0.0   ;;  %v572_v55 = vlaneseq }
  0x6b   : > { %4263 = vmatprep.subr.bf16.mxu1 %v4737_v35  ;;  %v4264_v36 = vpack.c.bf16 %v3836_v33, %v3835_v32  ;;  %v3838_v37 = vld [vmem:[%s4968_s21 + $0x38] sm:$0xff]  ;;  %4257 = vmatprep.subr.bf16.mxu0 %v4737_v35  ;;  %v568_v38 = vld [vmem:[%s4968_s21] sm:$0xff]  ;;  %v569_v39 = vld [vmem:[%s4968_s21 + $0x8] sm:$0xff]  ;;  %vm576_vm3 = vcmask 261120   ;;  %v4740_v57 = vmov 1983009808  }
  0x6c   : > { %v4258_v40 = vpack.c.bf16 %v569_v39, %v568_v38  ;;  %4060 = vmatprep.mubr.msk.f32.mxu1 %vm4738_vm2, %v4739_v41  ;;  %v570_v42 = vld [vmem:[%s4968_s21 + $0x10] sm:$0xff]  ;;  %v571_v43 = vld [vmem:[%s4968_s21 + $0x18] sm:$0xff]  ;;  %4043 = vmatprep.mubr.msk.f32.mxu0 %vm4738_vm2, %v4739_v41  ;;  %v4267_v44 = vpack.c.bf16 %v3838_v37, %v3837_v34  ;;  %v3842_v49 = vld [vmem:[%s4968_s21 + $0x40] sm:$0xff]  ;;  %v5039_v56 = vshrl.u32 %v572_v55, 7  ;;  %v849_v58 = vunpack.c.l.s4 %v4740_v57  ;;  %s4743_s17 = smov 112   ;;  %s4744_s15 = smov 104  }
  0x6d   : > { %4265 = vmatpush3.bf16.msra.mxu1 %v4264_v36  ;;  %v4261_v45 = vpack.c.bf16 %v571_v43, %v570_v42  ;;  %v3843_v50 = vld [vmem:[%s4968_s21 + $0x48] sm:$0xff]  ;;  %v3844_v52 = vld [vmem:[%s4968_s21 + $0x50] sm:$0xff]  ;;  %v3845_v53 = vld [vmem:[%s4968_s21 + $0x58] sm:$0xff]  ;;  %vm1027_vm4 = vcmask 64512   ;;  %vm1319_vm6 = vcmask 1041408   ;;  %vm4741_vm7 = vmmov 1  }
  0x6e   : > { %4266 = vmatprep.subr.bf16.mxu1 %v4737_v35  ;;  %4259 = vmatpush3.bf16.msra.mxu0 %v4258_v40  ;;  %v4270_v51 = vpack.c.bf16 %v3843_v50, %v3842_v49  ;;  %v4273_v54 = vpack.c.bf16 %v3845_v53, %v3844_v52  ;;  %v673_v59 = vsub.s32 1, %v5039_v56  ;;  %v5043_v60 = vld [vmem:[%s4973_s18] sm:$0xff]  ;;  %v574_v61 = vsub.s32 0, %v5039_v56  ;;  %vm5068_vm5 = vmpackc.low %vm1027_vm4, %vm1027_vm4  ;;  %s4742_s21 = smov 120   ;;  %s4745_s14 = smov 8  }
  0x6f   : > { %4260 = vmatprep.subr.bf16.mxu0 %v4737_v35  ;;  %v565_v48 = vld [vmem:[#allocation2 + $0x10] sm:$0xf]  ;;  %v850_v62 = vunpack.c.0.s8 %v849_v58  ;;  %vm5120_vm8 = vmpackc.low %vm1319_vm6, %vm4741_vm7  ;;  %vm1242_vm9 = vcmask 80896   ;;  %vm1246_vm10 = vcmask 74752   ;;  %s4746_s20 = smov 16   ;;  %vm3120_vm11 = vcmask 130048  }
  0x70   : > { %v563_v46 = vld [vmem:[#allocation2] sm:$0xff]  ;;  %v564_v47 = vld [vmem:[#allocation2 + $0x8] sm:$0xff]  ;;  %v674_v63 = vrot.slane %v5043_v60, %v673_v59  ;;  %v575_v0 = vrot.slane %v5043_v60, %v574_v61  ;;  %vm3124_vm12 = vcmask 195584   ;;  %vm3234_vm13 = vcmask 257024   ;;  %p3916_p4 = scmp.ne.s32.totalorder %s4722_s27, 1 }
  0x71   : > { %4268 = vmatpush3.bf16.msra.mxu1 %v4267_v44  ;;  %v5049_v1 = vsub.s32 %v850_v62, %v5039_v56  ;;  %vm3398_vm14 = vcmask 523264   ;;  %vm3649_vm15 = vcmask (!%p3916_p4), 254976  }
  0x72   : > { %4262 = vmatpush3.bf16.msra.mxu0 %v4261_v45  ;;  %4395 = vmatprep.subr.bf16.mxu1 %v4737_v35 }
  0x73   : > { %4269 = vmatprep.subr.bf16.mxu0 %v4737_v35 }
  0x74   : > { %4061 = vmatmul.mubr.msk.f32.vlgmr.msra.gmra.mrb[0].mxu1 %vm576_vm3, %v563_v46 }
  0x75   : > { %4063 = vmatprep.mubr.msk.f32.mxu1 %vm4738_vm2, %v4739_v41  ;;  %4044 = vmatmul.mubr.msk.f32.vlgmr.msra.gmra.mrb[0].mxu0 %vm576_vm3, %v563_v46 }
  0x76   : > { %4046 = vmatprep.mubr.msk.f32.mxu0 %vm4738_vm2, %v4739_v41  ;;  %4271 = vmatpush3.bf16.msra.mxu0 %v4270_v51 }
  0x77   : > { %4397 = vmatpush3.bf16.msra.mxu1 %v4270_v51  ;;  %4272 = vmatprep.subr.bf16.mxu0 %v4737_v35 }
  0x78   : > { %4064 = vmatmul.mubr.msk.f32.gmra.mrb[2].mxu1 %vm576_vm3, %v564_v47  ;;  %4396 = vmatprep.subr.bf16.mxu1 %v4737_v35 }
  0x79   : > { %4066 = vmatprep.mubr.msk.f32.mxu1 %vm4738_vm2, %v4739_v41  ;;  %4047 = vmatmul.mubr.msk.f32.gmra.mrb[2].mxu0 %vm576_vm3, %v564_v47 }
  0x7a   : > { %4049 = vmatprep.mubr.msk.f32.mxu0 %vm4738_vm2, %v4739_v41  ;;  %4274 = vmatpush3.bf16.msra.mxu0 %v4273_v54 }
  0x7b   : > { %4398 = vmatpush3.bf16.msra.mxu1 %v4273_v54 }
  0x7c   : > { %4067 = vmatmul.mubr.msk.f32.gmra.mrb[4].mxu1 %vm576_vm3, %v565_v48 }
  0x7d   : > { %4050 = vmatmul.mubr.msk.f32.gmra.mrb[4].mxu0 %vm576_vm3, %v565_v48  ;;  %4080 = vmatprep.mubr.msk.f32.mxu1 %vm4738_vm2, %v4739_v41 }
  0x7e   : > { %4077 = vmatprep.mubr.msk.f32.mxu0 %vm4738_vm2, %v4739_v41 }
  0x80   : > { %4081 = vmatmul.mubr.msk.f32.vlgmr.msra.gmra.mrb[6].mxu1 %vm576_vm3, %v564_v47 }
  0x81   : > { %4078 = vmatmul.mubr.msk.f32.vlgmr.msra.gmra.mrb[6].mxu0 %vm576_vm3, %v563_v46  ;;  %4083 = vmatprep.mubr.msk.f32.mxu1 %vm4738_vm2, %v4739_v41 }
  0x84   : > { %4084 = vmatmul.mubr.msk.f32.gmra.mrb[8].mxu1 %vm576_vm3, %v565_v48 }
 0x147   : > { %v741_v2 = vpop.f32.mrb[0].mxu1 }
 0x148   : > { %v742_v3 = vadd.f32 %v741_v2, %v674_v63  ;;  %v4062_v4 = vpop.f32.mrb[1].mxu1  ;;  %v652_v5 = vpop.f32.mrb[0].mxu0 }
 0x149   : > { %v653_v6 = vadd.f32 %v652_v5, %v575_v0  ;;  %v4045_v7 = vpop.f32.mrb[1].mxu0 }
 0x14a   : > { %v892_v8 = vcombine.high %v742_v3, %v742_v3  ;;  %v899_v9 = vrot.slane %v742_v3, %v5049_v1 }
 0x14b   : > { %v847_v10 = vcombine.high %v653_v6, %v653_v6  ;;  %v854_v11 = vrot.slane %v653_v6, %v5049_v1  ;;  %v746_v12 = vpop.f32.mrb[2].mxu1 }
 0x14c   : > { %v906_v13 = vrot.slane %v892_v8, %v5049_v1  ;;  %v907_v14 = vcombine.high %v899_v9, %v899_v9  ;;  %v747_v15 = vadd.f32 %v746_v12, %v674_v63  ;;  %v4065_v16 = vpop.f32.mrb[3].mxu1  ;;  %v657_v17 = vpop.f32.mrb[2].mxu0 }
 0x14d   : > { %v861_v18 = vrot.slane %v847_v10, %v5049_v1  ;;  %v862_v19 = vcombine.high %v854_v11, %v854_v11  ;;  %v658_v20 = vadd.f32 %v657_v17, %v575_v0  ;;  %v4048_v21 = vpop.f32.mrb[3].mxu0 }
 0x14e   : > { %v908_v22 = vcombine.high %v906_v13, %v906_v13  ;;  %v1003_v23 = vcombine.low %v899_v9, %v907_v14  ;;  %v909_v24 = vcombine.high %v747_v15, %v747_v15  ;;  %v916_v25 = vrot.slane %v747_v15, %v5049_v1 }
 0x14f   : > { %v863_v26 = vcombine.high %v861_v18, %v861_v18  ;;  %v979_v27 = vcombine.low %v854_v11, %v862_v19  ;;  %v751_v28 = vpop.f32.mrb[4].mxu1  ;;  %v864_v29 = vcombine.high %v658_v20, %v658_v20  ;;  %v871_v30 = vrot.slane %v658_v20, %v5049_v1 }
 0x150   : > { %v1004_v31 = vcombine.low %v906_v13, %v908_v22  ;;  %v1011_v32 = vrot.slane %v1003_v23, %v5049_v1  ;;  %v923_v33 = vrot.slane %v909_v24, %v5049_v1  ;;  %v924_v34 = vcombine.high %v916_v25, %v916_v25  ;;  %v4068_v36 = vpop.f32.mrb[5].mxu1  ;;  %v662_v37 = vpop.f32.mrb[4].mxu0 }
 0x151   : > { %v980_v38 = vcombine.low %v861_v18, %v863_v26  ;;  %v987_v39 = vrot.slane %v979_v27, %v5049_v1  ;;  %v1026_v40 = vrot.slane %v916_v25, %v5049_v1  ;;  %v752_v42 = vadd.f32 %v751_v28, %v674_v63  ;;  %v4051_v43 = vpop.f32.mrb[5].mxu0 }
 0x152   : > { %v1018_v44 = vrot.slane %v1004_v31, %v5049_v1  ;;  %v1135_v45 = vcombine.low %v924_v34, %v923_v33  ;;  %v925_v46 = vcombine.high %v923_v33, %v923_v33  ;;  %v878_v47 = vrot.slane %v864_v29, %v5049_v1 }
 0x153   : > { %v994_v48 = vrot.slane %v980_v38, %v5049_v1  ;;  %v932_v49 = vrot.slane %v752_v42, %v5049_v1  ;;  %v879_v50 = vcombine.high %v871_v30, %v871_v30  ;;  %v663_v53 = vadd.f32 %v662_v37, %v575_v0  ;;  %v835_v17 = vpop.f32.mrb[6].mxu1 }
 0x154   : > { %v1019_v51 = vcombine.low %v1011_v32, %v1018_v44  ;;  %v1143_v52 = vrot.slane %v1135_v45, %v5049_v1  ;;  %v880_v54 = vcombine.high %v878_v47, %v878_v47  ;;  %v5090_v10 = vrot.slane %v871_v30, %v5049_v1  ;;  %v830_v16 = vpop.f32.mrb[6].mxu0  ;;  %v4082_v20 = vpop.f32.mrb[7].mxu1 }
 0x155   : > { %v933_v55 = vcombine.high %v932_v49, %v932_v49  ;;  %v1136_v57 = vcombine.low %v925_v46, %v932_v49  ;;  %v1111_v58 = vcombine.low %v879_v50, %v878_v47  ;;  %v5072_v61 = vcombine.low %v987_v39, %v994_v48  ;;  %v4079_v21 = vpop.f32.mrb[7].mxu0 }
 0x156   : > { %v4275_v62 = vpack.c.bf16 %v1026_v40, %v1019_v51  ;;  %v887_v63 = vrot.slane %v663_v53, %v5049_v1  ;;  %v5075_v2 = vpack.i.bf16 %v1026_v40, %v1019_v51  ;;  %v762_v14 = vsub.s32 2, %v5039_v56 }
 0x157   : > { %v1150_v3 = vrot.slane %v1136_v57, %v5049_v1  ;;  %v1158_v0 = vrot.slane %v933_v55, %v5049_v1  ;;  %4090 = vmatprep.mubr.msk.f32.mxu1 %vm1027_vm4, %v5072_v61  ;;  %v1119_v4 = vrot.slane %v1111_v58, %v5049_v1  ;;  %v840_v26 = vpop.f32.mrb[8].mxu1 }
 0x158   : > { %4277 = vmatprep.subr.msk.bf16.mxu1 %vm5068_vm5, %v4275_v62  ;;  %v1112_v5 = vcombine.low %v880_v54, %v887_v63  ;;  %v888_v12 = vcombine.high %v887_v63, %v887_v63  ;;  %v763_v15 = vrot.slane %v5043_v60, %v762_v14  ;;  %v4085_v60 = vpop.f32.mrb[9].mxu1 }
 0x159   : > { %v1151_v6 = vcombine.low %v1143_v52, %v1150_v3  ;;  %4280 = vmatpush3.bf16.xpose.msk.msra.mxu1 %vm5068_vm5, %v4275_v62 }
 0x15a   : > { %v1126_v7 = vrot.slane %v1112_v5, %v5049_v1  ;;  %v5103_v13 = vrot.slane %v888_v12, %v5049_v1  ;;  %v831_v18 = vadd.f32 %v830_v16, %v763_v15  ;;  %v836_v19 = vadd.f32 %v835_v17, %v763_v15 }
 0x15b   : > { %v4281_v8 = vpack.c.bf16 %v1158_v0, %v1151_v6  ;;  %v5087_v9 = vpack.i.bf16 %v1158_v0, %v1151_v6  ;;  %v841_v31 = vadd.f32 %v840_v26, %v763_v15 }
 0x15c   : > { %v5092_v11 = vcombine.low %v1119_v4, %v1126_v7  ;;  %v937_v22 = vcombine.high %v831_v18, %v831_v18  ;;  %v944_v23 = vrot.slane %v831_v18, %v5049_v1  ;;  %v954_v24 = vcombine.high %v836_v19, %v836_v19 }
 0x15d   : > { %4283 = vmatprep.subr.msk.bf16.mxu1 %vm5068_vm5, %v4281_v8  ;;  %v961_v25 = vrot.slane %v836_v19, %v5049_v1  ;;  %v977_v37 = vrot.slane %v841_v31, %v5049_v1 }
 0x15e   : > { %v951_v27 = vrot.slane %v937_v22, %v5049_v1  ;;  %v952_v28 = vcombine.high %v944_v23, %v944_v23  ;;  %v968_v29 = vrot.slane %v954_v24, %v5049_v1 }
 0x15f   : > { %v969_v30 = vcombine.high %v961_v25, %v961_v25  ;;  %v1311_v44 = vrot.slane %v961_v25, %v5049_v1  ;;  %v978_v45 = vcombine.high %v977_v37, %v977_v37 }
 0x160   : > { %4091 = vmatmul.mubr.msk.f32.vlgmr.msra.gmra.mrb[10].mxu1 %vm1027_vm4, %v5090_v10  ;;  %v953_v32 = vcombine.high %v951_v27, %v951_v27  ;;  %v1288_v33 = vcombine.low %v944_v23, %v952_v28  ;;  %v970_v36 = vcombine.high %v968_v29, %v968_v29 }
 0x161   : > { %4286 = vmatpush3.bf16.xpose.msk.msra.mxu1 %vm5068_vm5, %v4281_v8  ;;  %4097 = vmatprep.mubr.msk.f32.mxu1 %vm1027_vm4, %v5092_v11  ;;  %v1397_v34 = vcombine.low %v969_v30, %v968_v29  ;;  %v1420_v49 = vrot.slane %v978_v45, %v5049_v1 }
 0x162   : > { %v1289_v38 = vcombine.low %v951_v27, %v953_v32  ;;  %v1296_v39 = vrot.slane %v1288_v33, %v5049_v1  ;;  %v1398_v42 = vcombine.low %v970_v36, %v977_v37 }
 0x163   : > { %v1405_v40 = vrot.slane %v1397_v34, %v5049_v1 }
 0x164   : > { %v1303_v43 = vrot.slane %v1289_v38, %v5049_v1  ;;  %v1412_v46 = vrot.slane %v1398_v42, %v5049_v1 }
 0x166   : > { %v1304_v47 = vcombine.low %v1296_v39, %v1303_v43  ;;  %v1413_v48 = vcombine.low %v1405_v40, %v1412_v46 }
 0x168   : > { %4098 = vmatmul.mubr.msk.f32.vlgmr.msra.gmra.mrb[12].mxu1 %vm1027_vm4, %v5103_v13  ;;  %v4287_v50 = vpack.c.bf16 %v1311_v44, %v1304_v47  ;;  %v5126_v52 = vpack.i.bf16 %v1311_v44, %v1304_v47  ;;  %v4293_v53 = vpack.c.bf16 %v1420_v49, %v1413_v48  ;;  %v5134_v54 = vpack.i.bf16 %v1420_v49, %v1413_v48 }
 0x16a   : > { %4289 = vmatprep.subr.msk.bf16.mxu0 %vm5120_vm8, %v4287_v50  ;;  %4295 = vmatprep.subr.msk.bf16.mxu1 %vm5120_vm8, %v4293_v53 }
 0x16b   : > { %4292 = vmatpush3.bf16.msk.msra.mxu0 %vm5120_vm8, %v4287_v50  ;;  %4298 = vmatpush3.bf16.msk.msra.mxu1 %vm5120_vm8, %v4293_v53 }
 0x233   : > { %v4092_v55 = vpop.f32.mrb[10].mxu1 }
 0x234   : > { %v1102_v57 = vpop.f32.mrb[11].mxu1  ;;  %v1247_v62 = vsel %vm1246_vm10, %v4092_v55, -inf }
 0x235   : > { %v1243_v58 = vsel %vm1242_vm9, %v1102_v57, -inf }
 0x236   : > { %1244 = vmax.xlane.f32.xlu0 %v1243_v58 }
 0x23a   : > { %1248 = vmax.xlane.f32.xlu0 %v1247_v62 }
 0x23b   : > { %v4099_v63 = vpop.f32.mrb[12].mxu1 }
 0x23c   : > { %v1233_v3 = vpop.f32.mrb[13].mxu1  ;;  %v1253_v4 = vsel %vm1246_vm10, %v4099_v63, -inf }
 0x23d   : > { %v1250_v0 = vsel %vm1242_vm9, %v1233_v3, -inf }
 0x23e   : > { %1251 = vmax.xlane.f32.xlu1 %v1250_v0 }
 0x242   : > { %1254 = vmax.xlane.f32.xlu1 %v1253_v4 }
 0x2c3   : > { %v1245_v5 = vpop.xlane.xlu0 %1244 }
 0x2c4   : > { %v1256_v6 = vsub.f32 %v1102_v57, %v1245_v5 }
 0x2c6   : > { %v1260_v7 = vmul.f32 1.442695, %v1256_v6 }
 0x2c7   : > { %v1249_v8 = vpop.xlane.xlu0 %1248 }
 0x2c8   : > { %4536 = vpow2.f32 %v1260_v7  ;;  %v1257_v12 = vsub.f32 %v4092_v55, %v1249_v8 }
 0x2ca   : > { %v1262_v14 = vmul.f32 1.442695, %v1257_v12 }
 0x2cb   : > { %v1252_v15 = vpop.xlane.xlu1 %1251 }
 0x2cc   : > { %4538 = vpow2.f32 %v1262_v14  ;;  %v1258_v16 = vsub.f32 %v1233_v3, %v1252_v15 }
 0x2ce   : > { %v1264_v17 = vmul.f32 1.442695, %v1258_v16 }
 0x2cf   : > { %v1255_v18 = vpop.xlane.xlu1 %1254 }
 0x2d0   : > { %4540 = vpow2.f32 %v1264_v17  ;;  %v1259_v19 = vsub.f32 %v4099_v63, %v1255_v18 }
 0x2d2   : > { %v4537_v20 = vpop.eup %4536  ;;  %v1266_v21 = vmul.f32 1.442695, %v1259_v19 }
 0x2d3   : > { %v1268_v22 = vsel %vm1242_vm9, %v4537_v20, 0.0 }
 0x2d4   : > { %4542 = vpow2.f32 %v1266_v21  ;;  %1269 = vadd.xlane.f32.xlu0 %v1268_v22 }
 0x2d6   : > { %v4539_v23 = vpop.eup %4538 }
 0x2d7   : > { %v1271_v24 = vsel %vm1246_vm10, %v4539_v23, 0.0 }
 0x2d8   : > { %1272 = vadd.xlane.f32.xlu1 %v1271_v24 }
 0x2da   : > { %v4541_v25 = vpop.eup %4540 }
 0x2db   : > { %v1274_v26 = vsel %vm1242_vm9, %v4541_v25, 0.0 }
 0x2dc   : > { %1275 = vadd.xlane.f32.xlu0 %v1274_v26 }
 0x2de   : > { %v4543_v27 = vpop.eup %4542 }
 0x2df   : > { %v1277_v28 = vsel %vm1246_vm10, %v4543_v27, 0.0 }
 0x2e0   : > { %1278 = vadd.xlane.f32.xlu1 %v1277_v28 }
 0x2f1   : > { %4482 = vrot.lane.b32.xlu1 %v5087_v9, %s4742_s21 }
 0x2f2   : > { %4477 = vrot.lane.b32.xlu0 %v5075_v2, %s4742_s21 }
 0x2f5   : > { %1557 = vrot.lane.b32.xlu1 %v5072_v61, %s4742_s21 }
 0x2f6   : > { %1648 = vrot.lane.b32.xlu0 %v5092_v11, %s4742_s21 }
 0x2f9   : > { %1559 = vrot.lane.b32.xlu1 %v5090_v10, %s4742_s21 }
 0x2fd   : > { %1650 = vrot.lane.b32.xlu1 %v5103_v13, %s4742_s21 }
 0x361   : > { %v1270_v29 = vpop.xlane.xlu0 %1269 }
 0x362   : > { %4544 = vrcp.f32 %v1270_v29 }
 0x365   : > { %v1273_v30 = vpop.xlane.xlu1 %1272 }
 0x366   : > { %4546 = vrcp.f32 %v1273_v30 }
 0x369   : > { %v1276_v60 = vpop.xlane.xlu0 %1275 }
 0x36a   : > { %4548 = vrcp.f32 %v1276_v60 }
 0x36c   : > { %v4545_v31 = vpop.eup %4544 }
 0x36d   : > { %v4478_v32 = vpop.permute.xlu0 %4477  ;;  %v1279_v33 = vpop.xlane.xlu1 %1278  ;;  %v1284_v34 = vmul.f32 %v4545_v31, %v4537_v20 }
 0x36e   : > { %v4480_v36 = vunpack.i.h.bf16 %v4478_v32  ;;  %v4479_v37 = vunpack.i.l.bf16 %v4478_v32  ;;  %4550 = vrcp.f32 %v1279_v33 }
 0x36f   : > { %4104 = vmatprep.mubr.msk.f32.mxu0 %vm1242_vm9, %v1284_v34 }
 0x370   : > { %v4547_v38 = vpop.eup %4546  ;;  %v4299_v39 = vpack.c.bf16 %v4480_v36, %v4479_v37 }
 0x371   : > { %v1285_v40 = vmul.f32 %v4547_v38, %v4539_v23  ;;  %v4483_v42 = vpop.permute.xlu1 %4482  ;;  %v1649_v55 = vpop.permute.xlu0 %1648 }
 0x372   : > { %v4485_v43 = vunpack.i.h.bf16 %v4483_v42  ;;  %v4484_v44 = vunpack.i.l.bf16 %v4483_v42  ;;  %4301 = vmatprep.subr.msk.bf16.mxu0 %vm5068_vm5, %v4299_v39 }
 0x373   : > { %4105 = vmatmul.mubr.msk.f32.vlgmr.msra.gmra.mrb[8].mxu0 %vm1242_vm9, %v1285_v40 }
 0x374   : > { %v4549_v45 = vpop.eup %4548  ;;  %v4305_v46 = vpack.c.bf16 %v4485_v43, %v4484_v44  ;;  %4304 = vmatpush3.bf16.xpose.msk.msra.mxu0 %vm5068_vm5, %v4299_v39 }
 0x375   : > { %v1558_v47 = vpop.permute.xlu1 %1557  ;;  %v1286_v48 = vmul.f32 %v4549_v45, %v4541_v25 }
 0x376   : > { %4118 = vmatprep.mubr.msk.f32.mxu0 %vm1027_vm4, %v1558_v47  ;;  %4307 = vmatprep.subr.msk.bf16.mxu1 %vm5068_vm5, %v4305_v46 }
 0x377   : > { %4111 = vmatprep.mubr.msk.f32.mxu1 %vm1242_vm9, %v1286_v48 }
 0x378   : > { %v4551_v49 = vpop.eup %4550 }
 0x379   : > { %v1287_v50 = vmul.f32 %v4551_v49, %v4543_v27  ;;  %v1560_v53 = vpop.permute.xlu1 %1559 }
 0x37b   : > { %4119 = vmatmul.mubr.msk.f32.vlgmr.msra.gmra.mrb[10].mxu0 %vm1027_vm4, %v1560_v53  ;;  %4112 = vmatmul.mubr.msk.f32.vlgmr.msra.gmra.mrb[14].mxu1 %vm1242_vm9, %v1287_v50 }
 0x37c   : > { %4310 = vmatpush3.bf16.xpose.msk.msra.mxu1 %vm5068_vm5, %v4305_v46  ;;  %4125 = vmatprep.mubr.msk.f32.mxu1 %vm1027_vm4, %v1649_v55 }
 0x37d   : > { %v1651_v57 = vpop.permute.xlu1 %1650 }
 0x383   : > { %4126 = vmatmul.mubr.msk.f32.vlgmr.msra.gmra.mrb[16].mxu1 %vm1027_vm4, %v1651_v57 }
 0x446   : > { %v4106_v58 = vpop.f32.mrb[8].mxu0 }
 0x447   : > { %v5172_v62 = vpop.f32.mrb[9].mxu0  ;;  %v1532_v6 = vrot.slane %v4106_v58, %v5049_v1 }
 0x44e   : > { %v4120_v63 = vpop.f32.mrb[10].mxu0  ;;  %v4113_v3 = vpop.f32.mrb[14].mxu1 }
 0x44f   : > { %v1639_v0 = vpop.f32.mrb[11].mxu0  ;;  %v1496_v4 = vpop.f32.mrb[15].mxu1  ;;  %v1742_v5 = vsel %vm1246_vm10, %v4120_v63, -inf  ;;  %v1556_v17 = vrot.slane %v4113_v3, %v5049_v1 }
 0x450   : > { %v1533_v7 = vcombine.high %v1496_v4, %v1496_v4  ;;  %v1540_v8 = vrot.slane %v1496_v4, %v5049_v1  ;;  %1743 = vmax.xlane.f32.xlu1 %v1742_v5  ;;  %v1739_v12 = vsel %vm1242_vm9, %v1639_v0, -inf }
 0x451   : > { %1740 = vmax.xlane.f32.xlu0 %v1739_v12 }
 0x452   : > { %v1547_v14 = vrot.slane %v1533_v7, %v5049_v1  ;;  %v1548_v15 = vcombine.high %v1540_v8, %v1540_v8  ;;  %v2936_v16 = vcombine.low %v1532_v6, %v1540_v8 }
 0x454   : > { %v1549_v18 = vcombine.high %v1547_v14, %v1547_v14  ;;  %v2937_v19 = vcombine.low %v1548_v15, %v1547_v14  ;;  %v2944_v20 = vrot.slane %v2936_v16, %v5049_v1 }
 0x456   : > { %v2951_v21 = vrot.slane %v2937_v19, %v5049_v1  ;;  %v5182_v22 = vcombine.low %v1549_v18, %v1556_v17  ;;  %v4127_v23 = vpop.f32.mrb[16].mxu1 }
 0x457   : > { %v1730_v24 = vpop.f32.mrb[17].mxu1  ;;  %v1748_v27 = vsel %vm1246_vm10, %v4127_v23, -inf }
 0x458   : > { %v1745_v25 = vsel %vm1242_vm9, %v1730_v24, -inf  ;;  %v5185_v26 = vcombine.low %v2944_v20, %v2951_v21 }
 0x459   : > { %1746 = vmax.xlane.f32.xlu0 %v1745_v25 }
 0x45d   : > { %1749 = vmax.xlane.f32.xlu0 %v1748_v27 }
 0x461   : > { %4492 = vrot.lane.b32.xlu1 %v5134_v54, %s4742_s21 }
 0x465   : > { %4497 = vrot.lane.b32.xlu1 %v5075_v2, %s4743_s17 }
 0x469   : > { %4502 = vrot.lane.b32.xlu1 %v5087_v9, %s4743_s17 }
 0x473   : > { %4487 = vrot.lane.b32.xlu0 %v5126_v52, %s4742_s21 }
 0x4dd   : > { %v1744_v28 = vpop.xlane.xlu1 %1743 }
 0x4de   : > { %v1752_v29 = vsub.f32 %v4120_v63, %v1744_v28  ;;  %v1741_v30 = vpop.xlane.xlu0 %1740 }
 0x4df   : > { %v1751_v60 = vsub.f32 %v1639_v0, %v1741_v30 }
 0x4e0   : > { %v1757_v31 = vmul.f32 1.442695, %v1752_v29 }
 0x4e1   : > { %v1755_v32 = vmul.f32 1.442695, %v1751_v60  ;;  %v4493_v33 = vpop.permute.xlu1 %4492 }
 0x4e2   : > { %4552 = vpow2.f32 %v1757_v31  ;;  %v4495_v34 = vunpack.i.h.bf16 %v4493_v33  ;;  %v4494_v36 = vunpack.i.l.bf16 %v4493_v33 }
 0x4e3   : > { %4554 = vpow2.f32 %v1755_v32 }
 0x4e4   : > { %v4317_v37 = vpack.c.bf16 %v4495_v34, %v4494_v36 }
 0x4e5   : > { %v4498_v38 = vpop.permute.xlu1 %4497 }
 0x4e6   : > { %4319 = vmatprep.subr.msk.bf16.mxu1 %vm5120_vm8, %v4317_v37  ;;  %v1747_v39 = vpop.xlane.xlu0 %1746  ;;  %v4500_v57 = vunpack.i.h.bf16 %v4498_v38  ;;  %v4499_v3 = vunpack.i.l.bf16 %v4498_v38 }
 0x4e7   : > { %v1753_v40 = vsub.f32 %v1730_v24, %v1747_v39  ;;  %4322 = vmatpush3.bf16.msk.msra.mxu1 %vm5120_vm8, %v4317_v37 }
 0x4e8   : > { %v4323_v6 = vpack.c.bf16 %v4500_v57, %v4499_v3 }
 0x4e9   : > { %v1759_v42 = vmul.f32 1.442695, %v1753_v40  ;;  %v4503_v43 = vpop.permute.xlu1 %4502 }
 0x4ea   : > { %v4505_v44 = vunpack.i.h.bf16 %v4503_v43  ;;  %v4504_v45 = vunpack.i.l.bf16 %v4503_v43  ;;  %v1750_v46 = vpop.xlane.xlu0 %1749 }
 0x4eb   : > { %4556 = vpow2.f32 %v1759_v42  ;;  %v1754_v47 = vsub.f32 %v4127_v23, %v1750_v46 }
 0x4ec   : > { %v4553_v48 = vpop.eup %4552  ;;  %v4329_v49 = vpack.c.bf16 %v4505_v44, %v4504_v45 }
 0x4ed   : > { %v4555_v50 = vpop.eup %4554  ;;  %v1761_v53 = vmul.f32 1.442695, %v1754_v47  ;;  %v1766_v55 = vsel %vm1246_vm10, %v4553_v48, 0.0 }
 0x4ee   : > { %1767 = vadd.xlane.f32.xlu1 %v1766_v55  ;;  %4331 = vmatprep.subr.msk.bf16.mxu1 %vm5068_vm5, %v4329_v49  ;;  %v4488_v58 = vpop.permute.xlu0 %4487  ;;  %v1763_v63 = vsel %vm1242_vm9, %v4555_v50, 0.0 }
 0x4ef   : > { %4558 = vpow2.f32 %v1761_v53  ;;  %v4490_v0 = vunpack.i.h.bf16 %v4488_v58  ;;  %v4489_v4 = vunpack.i.l.bf16 %v4488_v58  ;;  %1764 = vadd.xlane.f32.xlu0 %v1763_v63 }
 0x4f1   : > { %v4311_v5 = vpack.c.bf16 %v4490_v0, %v4489_v4 }
 0x4f3   : > { %4313 = vmatprep.subr.msk.bf16.mxu0 %vm5120_vm8, %v4311_v5 }
 0x4f4   : > { %4316 = vmatpush3.bf16.msk.msra.mxu0 %vm5120_vm8, %v4311_v5 }
 0x4f5   : > { %v4557_v7 = vpop.eup %4556  ;;  %4325 = vmatprep.subr.msk.bf16.mxu0 %vm5068_vm5, %v4323_v6 }
 0x4f6   : > { %v1769_v8 = vsel %vm1242_vm9, %v4557_v7, 0.0 }
 0x4f7   : > { %1770 = vadd.xlane.f32.xlu0 %v1769_v8 }
 0x4f9   : > { %v4559_v12 = vpop.eup %4558 }
 0x4fa   : > { %v1772_v14 = vsel %vm1246_vm10, %v4559_v12, 0.0 }
 0x4fb   : > { %1773 = vadd.xlane.f32.xlu1 %v1772_v14 }
 0x50c   : > { %2013 = vrot.lane.b32.xlu1 %v5090_v10, %s4743_s17 }
 0x50d   : > { %2011 = vrot.lane.b32.xlu0 %v5072_v61, %s4743_s17 }
 0x510   : > { %2104 = vrot.lane.b32.xlu1 %v5103_v13, %s4743_s17 }
 0x511   : > { %2102 = vrot.lane.b32.xlu0 %v5092_v11, %s4743_s17 }
 0x57b   : > { %v1768_v15 = vpop.xlane.xlu1 %1767 }
 0x57c   : > { %4560 = vrcp.f32 %v1768_v15  ;;  %v1765_v16 = vpop.xlane.xlu0 %1764 }
 0x57d   : > { %4562 = vrcp.f32 %v1765_v16 }
 0x584   : > { %v1771_v17 = vpop.xlane.xlu0 %1770 }
 0x585   : > { %4564 = vrcp.f32 %v1771_v17 }
 0x586   : > { %v4561_v18 = vpop.eup %4560 }
 0x587   : > { %v4563_v19 = vpop.eup %4562  ;;  %v1780_v23 = vmul.f32 %v4561_v18, %v4553_v48 }
 0x588   : > { %v1774_v20 = vpop.xlane.xlu1 %1773  ;;  %v1779_v21 = vmul.f32 %v4563_v19, %v4555_v50  ;;  %v2012_v24 = vpop.permute.xlu0 %2011 }
 0x589   : > { %4566 = vrcp.f32 %v1774_v20 }
 0x58a   : > { %4132 = vmatprep.mubr.msk.f32.mxu0 %vm1242_vm9, %v1779_v21 }
 0x58b   : > { %4133 = vmatmul.mubr.msk.f32.vlgmr.msra.gmra.mrb[12].mxu0 %vm1242_vm9, %v1780_v23 }
 0x58c   : > { %4328 = vmatpush3.bf16.xpose.msk.msra.mxu0 %vm5068_vm5, %v4323_v6  ;;  %4146 = vmatprep.mubr.msk.f32.mxu0 %vm1027_vm4, %v2012_v24  ;;  %v2014_v28 = vpop.permute.xlu1 %2013  ;;  %v2103_v60 = vpop.permute.xlu0 %2102 }
 0x58f   : > { %v4565_v25 = vpop.eup %4564 }
 0x590   : > { %v1781_v27 = vmul.f32 %v4565_v25, %v4557_v7  ;;  %v2105_v31 = vpop.permute.xlu1 %2104 }
 0x592   : > { %4139 = vmatprep.mubr.msk.f32.mxu1 %vm1242_vm9, %v1781_v27 }
 0x593   : > { %v4567_v29 = vpop.eup %4566  ;;  %4147 = vmatmul.mubr.msk.f32.vlgmr.msra.gmra.mrb[14].mxu0 %vm1027_vm4, %v2014_v28 }
 0x594   : > { %v1782_v30 = vmul.f32 %v4567_v29, %v4559_v12 }
 0x596   : > { %4140 = vmatmul.mubr.msk.f32.vlgmr.msra.gmra.mrb[18].mxu1 %vm1242_vm9, %v1782_v30 }
 0x597   : > { %4334 = vmatpush3.bf16.xpose.msk.msra.mxu1 %vm5068_vm5, %v4329_v49  ;;  %4153 = vmatprep.mubr.msk.f32.mxu1 %vm1027_vm4, %v2103_v60 }
 0x59e   : > { %4154 = vmatmul.mubr.msk.f32.vlgmr.msra.gmra.mrb[20].mxu1 %vm1027_vm4, %v2105_v31 }
 0x65e   : > { %v4134_v32 = vpop.f32.mrb[12].mxu0 }
 0x65f   : > { %v5232_v33 = vpop.f32.mrb[13].mxu0  ;;  %v1986_v42 = vrot.slane %v4134_v32, %v5049_v1 }
 0x666   : > { %v4148_v34 = vpop.f32.mrb[14].mxu0 }
 0x667   : > { %v2093_v36 = vpop.f32.mrb[15].mxu0  ;;  %v2196_v37 = vsel %vm1246_vm10, %v4148_v34, -inf }
 0x668   : > { %2197 = vmax.xlane.f32.xlu1 %v2196_v37  ;;  %v2193_v38 = vsel %vm1242_vm9, %v2093_v36, -inf }
 0x669   : > { %2194 = vmax.xlane.f32.xlu0 %v2193_v38  ;;  %v4141_v39 = vpop.f32.mrb[18].mxu1 }
 0x66a   : > { %v1950_v40 = vpop.f32.mrb[19].mxu1  ;;  %v2010_v48 = vrot.slane %v4141_v39, %v5049_v1 }
 0x66b   : > { %v1987_v43 = vcombine.high %v1950_v40, %v1950_v40  ;;  %v1994_v44 = vrot.slane %v1950_v40, %v5049_v1 }
 0x66d   : > { %v2001_v45 = vrot.slane %v1987_v43, %v5049_v1  ;;  %v2002_v46 = vcombine.high %v1994_v44, %v1994_v44  ;;  %v2981_v47 = vcombine.low %v1986_v42, %v1994_v44 }
 0x66f   : > { %v2003_v49 = vcombine.high %v2001_v45, %v2001_v45  ;;  %v2982_v50 = vcombine.low %v2002_v46, %v2001_v45  ;;  %v2989_v53 = vrot.slane %v2981_v47, %v5049_v1 }
 0x671   : > { %v4155_v55 = vpop.f32.mrb[20].mxu1  ;;  %v2996_v57 = vrot.slane %v2982_v50, %v5049_v1  ;;  %v5242_v58 = vcombine.low %v2003_v49, %v2010_v48 }
 0x672   : > { %v2184_v63 = vpop.f32.mrb[21].mxu1  ;;  %v2202_v4 = vsel %vm1246_vm10, %v4155_v55, -inf }
 0x673   : > { %v2199_v3 = vsel %vm1242_vm9, %v2184_v63, -inf  ;;  %v5245_v0 = vcombine.low %v2989_v53, %v2996_v57 }
 0x674   : > { %2200 = vmax.xlane.f32.xlu0 %v2199_v3 }
 0x678   : > { %2203 = vmax.xlane.f32.xlu0 %v2202_v4 }
 0x679   : > { %4512 = vrot.lane.b32.xlu1 %v5134_v54, %s4743_s17 }
 0x67d   : > { %4517 = vrot.lane.b32.xlu1 %v5075_v2, %s4744_s15 }
 0x681   : > { %4522 = vrot.lane.b32.xlu1 %v5087_v9, %s4744_s15 }
 0x68e   : > { %4507 = vrot.lane.b32.xlu0 %v5126_v52, %s4743_s17 }
 0x6f5   : > { %v2198_v5 = vpop.xlane.xlu1 %2197 }
 0x6f6   : > { %v2206_v6 = vsub.f32 %v4148_v34, %v2198_v5  ;;  %v2195_v7 = vpop.xlane.xlu0 %2194 }
 0x6f7   : > { %v2205_v8 = vsub.f32 %v2093_v36, %v2195_v7 }
 0x6f8   : > { %v2211_v12 = vmul.f32 1.442695, %v2206_v6 }
 0x6f9   : > { %v2209_v14 = vmul.f32 1.442695, %v2205_v8  ;;  %v4513_v15 = vpop.permute.xlu1 %4512 }
 0x6fa   : > { %4568 = vpow2.f32 %v2211_v12  ;;  %v4515_v16 = vunpack.i.h.bf16 %v4513_v15  ;;  %v4514_v17 = vunpack.i.l.bf16 %v4513_v15 }
 0x6fb   : > { %4570 = vpow2.f32 %v2209_v14 }
 0x6fc   : > { %v4341_v18 = vpack.c.bf16 %v4515_v16, %v4514_v17 }
 0x6fd   : > { %v4518_v19 = vpop.permute.xlu1 %4517 }
 0x6fe   : > { %4343 = vmatprep.subr.msk.bf16.mxu1 %vm5120_vm8, %v4341_v18  ;;  %v4520_v34 = vunpack.i.h.bf16 %v4518_v19  ;;  %v4519_v37 = vunpack.i.l.bf16 %v4518_v19 }
 0x6ff   : > { %4346 = vmatpush3.bf16.msk.msra.mxu1 %vm5120_vm8, %v4341_v18 }
 0x700   : > { %v4347_v42 = vpack.c.bf16 %v4520_v34, %v4519_v37 }
 0x701   : > { %v4523_v2 = vpop.permute.xlu1 %4522  ;;  %v2201_v9 = vpop.xlane.xlu0 %2200 }
 0x702   : > { %v4525_v20 = vunpack.i.h.bf16 %v4523_v2  ;;  %v4524_v21 = vunpack.i.l.bf16 %v4523_v2  ;;  %v2207_v23 = vsub.f32 %v2184_v63, %v2201_v9 }
 0x704   : > { %v4569_v24 = vpop.eup %4568  ;;  %v4353_v25 = vpack.c.bf16 %v4525_v20, %v4524_v21  ;;  %v2213_v27 = vmul.f32 1.442695, %v2207_v23 }
 0x705   : > { %v4571_v28 = vpop.eup %4570  ;;  %v2204_v29 = vpop.xlane.xlu0 %2203  ;;  %v2220_v30 = vsel %vm1246_vm10, %v4569_v24, 0.0 }
 0x706   : > { %4572 = vpow2.f32 %v2213_v27  ;;  %v2208_v60 = vsub.f32 %v4155_v55, %v2204_v29  ;;  %2221 = vadd.xlane.f32.xlu1 %v2220_v30  ;;  %4355 = vmatprep.subr.msk.bf16.mxu1 %vm5068_vm5, %v4353_v25  ;;  %v2217_v31 = vsel %vm1242_vm9, %v4571_v28, 0.0 }
 0x707   : > { %2218 = vadd.xlane.f32.xlu0 %v2217_v31 }
 0x708   : > { %v2215_v32 = vmul.f32 1.442695, %v2208_v60 }
 0x709   : > { %v4508_v36 = vpop.permute.xlu0 %4507 }
 0x70a   : > { %4574 = vpow2.f32 %v2215_v32  ;;  %v4510_v38 = vunpack.i.h.bf16 %v4508_v36  ;;  %v4509_v39 = vunpack.i.l.bf16 %v4508_v36 }
 0x70c   : > { %v4335_v40 = vpack.c.bf16 %v4510_v38, %v4509_v39 }
 0x70e   : > { %4337 = vmatprep.subr.msk.bf16.mxu0 %vm5120_vm8, %v4335_v40 }
 0x70f   : > { %4340 = vmatpush3.bf16.msk.msra.mxu0 %vm5120_vm8, %v4335_v40 }
 0x710   : > { %v4573_v43 = vpop.eup %4572  ;;  %4349 = vmatprep.subr.msk.bf16.mxu0 %vm5068_vm5, %v4347_v42 }
 0x711   : > { %v2223_v44 = vsel %vm1242_vm9, %v4573_v43, 0.0 }
 0x712   : > { %2224 = vadd.xlane.f32.xlu0 %v2223_v44 }
 0x714   : > { %v4575_v45 = vpop.eup %4574 }
 0x715   : > { %v2226_v46 = vsel %vm1246_vm10, %v4575_v45, 0.0 }
 0x716   : > { %2227 = vadd.xlane.f32.xlu1 %v2226_v46 }
 0x727   : > { %2467 = vrot.lane.b32.xlu1 %v5090_v10, %s4744_s15 }
 0x728   : > { %2465 = vrot.lane.b32.xlu0 %v5072_v61, %s4744_s15 }
 0x72b   : > { %2558 = vrot.lane.b32.xlu1 %v5103_v13, %s4744_s15 }
 0x72c   : > { %2556 = vrot.lane.b32.xlu0 %v5092_v11, %s4744_s15 }
 0x793   : > { %v2222_v47 = vpop.xlane.xlu1 %2221 }
 0x794   : > { %4576 = vrcp.f32 %v2222_v47  ;;  %v2219_v48 = vpop.xlane.xlu0 %2218 }
 0x795   : > { %4578 = vrcp.f32 %v2219_v48 }
 0x79e   : > { %v4577_v49 = vpop.eup %4576 }
 0x79f   : > { %v4579_v50 = vpop.eup %4578  ;;  %v2225_v53 = vpop.xlane.xlu0 %2224  ;;  %v2234_v57 = vmul.f32 %v4577_v49, %v4569_v24 }
 0x7a0   : > { %4580 = vrcp.f32 %v2225_v53  ;;  %v2233_v55 = vmul.f32 %v4579_v50, %v4571_v28 }
 0x7a2   : > { %4160 = vmatprep.mubr.msk.f32.mxu0 %vm1242_vm9, %v2233_v55 }
 0x7a3   : > { %v2228_v10 = vpop.xlane.xlu1 %2227  ;;  %v2466_v61 = vpop.permute.xlu0 %2465  ;;  %4161 = vmatmul.mubr.msk.f32.vlgmr.msra.gmra.mrb[16].mxu0 %vm1242_vm9, %v2234_v57 }
 0x7a4   : > { %4582 = vrcp.f32 %v2228_v10  ;;  %4352 = vmatpush3.bf16.xpose.msk.msra.mxu0 %vm5068_vm5, %v4347_v42  ;;  %4174 = vmatprep.mubr.msk.f32.mxu0 %vm1027_vm4, %v2466_v61 }
 0x7a7   : > { %v2468_v13 = vpop.permute.xlu1 %2467  ;;  %v2557_v5 = vpop.permute.xlu0 %2556 }
 0x7aa   : > { %v4581_v11 = vpop.eup %4580 }
 0x7ab   : > { %4175 = vmatmul.mubr.msk.f32.vlgmr.msra.gmra.mrb[18].mxu0 %vm1027_vm4, %v2468_v13  ;;  %v2235_v63 = vmul.f32 %v4581_v11, %v4573_v43  ;;  %v2559_v6 = vpop.permute.xlu1 %2558  ;;  %v1963_v11 = vcombine.high %v5232_v33, %v5232_v33 }
 0x7ad   : > { %4167 = vmatprep.mubr.msk.f32.mxu1 %vm1242_vm9, %v2235_v63  ;;  %v1977_v63 = vrot.slane %v1963_v11, %v5049_v1 }
 0x7ae   : > { %v4583_v3 = vpop.eup %4582 }
 0x7af   : > { %v2236_v4 = vmul.f32 %v4583_v3, %v4575_v45 }
 0x7b1   : > { %4168 = vmatmul.mubr.msk.f32.vlgmr.msra.gmra.mrb[22].mxu1 %vm1242_vm9, %v2236_v4  ;;  %v1970_v4 = vrot.slane %v5232_v33, %v5049_v1 }
 0x7b2   : > { %4358 = vmatpush3.bf16.xpose.msk.msra.mxu1 %vm5068_vm5, %v4353_v25  ;;  %4181 = vmatprep.mubr.msk.f32.mxu1 %vm1027_vm4, %v2557_v5  ;;  %v1979_v5 = vcombine.high %v1977_v63, %v1977_v63 }
 0x7b9   : > { %4182 = vmatmul.mubr.msk.f32.vlgmr.msra.gmra.mrb[24].mxu1 %vm1027_vm4, %v2559_v6 }
 0x876   : > { %v4162_v7 = vpop.f32.mrb[16].mxu0 }
 0x877   : > { %v5292_v8 = vpop.f32.mrb[17].mxu0  ;;  %v2440_v59 = vrot.slane %v4162_v7, %v5049_v1  ;;  %v1978_v7 = vcombine.high %v1970_v4, %v1970_v4 }
 0x878   : > { %v2417_v3 = vcombine.high %v5292_v8, %v5292_v8 }
 0x87a   : > { %v2431_v6 = vrot.slane %v2417_v3, %v5049_v1 }
 0x87e   : > { %v4176_v12 = vpop.f32.mrb[18].mxu0 }
 0x87f   : > { %v2547_v14 = vpop.f32.mrb[19].mxu0  ;;  %v2650_v15 = vsel %vm1246_vm10, %v4176_v12, -inf }
 0x880   : > { %2651 = vmax.xlane.f32.xlu1 %v2650_v15  ;;  %v2647_v16 = vsel %vm1242_vm9, %v2547_v14, -inf  ;;  %v2433_v15 = vcombine.high %v2431_v6, %v2431_v6 }
 0x881   : > { %2648 = vmax.xlane.f32.xlu0 %v2647_v16  ;;  %v2964_v16 = vcombine.low %v1970_v4, %v1978_v7 }
 0x884   : > { %v4169_v17 = vpop.f32.mrb[22].mxu1 }
 0x885   : > { %v2404_v18 = vpop.f32.mrb[23].mxu1  ;;  %v2464_v23 = vrot.slane %v4169_v17, %v5049_v1 }
 0x886   : > { %v2441_v19 = vcombine.high %v2404_v18, %v2404_v18  ;;  %v2448_v2 = vrot.slane %v2404_v18, %v5049_v1  ;;  %v3016_v18 = vcombine.low %v2431_v6, %v2433_v15 }
 0x888   : > { %v2455_v9 = vrot.slane %v2441_v19, %v5049_v1  ;;  %v2456_v20 = vcombine.high %v2448_v2, %v2448_v2  ;;  %v3032_v21 = vcombine.low %v2440_v59, %v2448_v2  ;;  %v2972_v19 = vrot.slane %v2964_v16, %v5049_v1 }
 0x88a   : > { %v2457_v24 = vcombine.high %v2455_v9, %v2455_v9  ;;  %v3033_v25 = vcombine.low %v2456_v20, %v2455_v9  ;;  %v3040_v27 = vrot.slane %v3032_v21, %v5049_v1  ;;  %v3030_v9 = vrot.slane %v3016_v18, %v5049_v1 }
 0x88c   : > { %v4183_v28 = vpop.f32.mrb[24].mxu1  ;;  %v3047_v29 = vrot.slane %v3033_v25, %v5049_v1  ;;  %v5302_v30 = vcombine.low %v2457_v24, %v2464_v23 }
 0x88d   : > { %v2638_v60 = vpop.f32.mrb[25].mxu1  ;;  %v2656_v34 = vsel %vm1246_vm10, %v4183_v28, -inf }
 0x88e   : > { %v2653_v31 = vsel %vm1242_vm9, %v2638_v60, -inf  ;;  %v3048_v32 = vcombine.low %v3040_v27, %v3047_v29 }
 0x88f   : > { %2654 = vmax.xlane.f32.xlu0 %v2653_v31 }
 0x893   : > { %2657 = vmax.xlane.f32.xlu0 %v2656_v34 }
 0x90d   : > { %v2652_v36 = vpop.xlane.xlu1 %2651 }
 0x90e   : > { %v2660_v37 = vsub.f32 %v4176_v12, %v2652_v36  ;;  %v2649_v38 = vpop.xlane.xlu0 %2648  ;;  %v2424_v12 = vrot.slane %v5292_v8, %v5049_v1 }
 0x90f   : > { %v2659_v39 = vsub.f32 %v2547_v14, %v2649_v38  ;;  %v2965_v14 = vcombine.low %v1977_v63, %v1979_v5 }
 0x910   : > { %v2665_v40 = vmul.f32 1.442695, %v2660_v37  ;;  %v2432_v17 = vcombine.high %v2424_v12, %v2424_v12 }
 0x911   : > { %v2663_v42 = vmul.f32 1.442695, %v2659_v39  ;;  %v2979_v59 = vrot.slane %v2965_v14, %v5049_v1 }
 0x912   : > { %4584 = vpow2.f32 %v2665_v40  ;;  %v3015_v2 = vcombine.low %v2424_v12, %v2432_v17 }
 0x913   : > { %4586 = vpow2.f32 %v2663_v42  ;;  %v2980_v33 = vcombine.low %v2972_v19, %v2979_v59 }
 0x914   : > { %v3023_v8 = vrot.slane %v3015_v2, %v5049_v1 }
 0x916   : > { %v3031_v20 = vcombine.low %v3023_v8, %v3030_v9  ;;  %v3005_v8 = vrot.slane %v5242_v58, %v5049_v1 }
 0x91c   : > { %v5306_v43 = vpop.eup %4584  ;;  %v2655_v44 = vpop.xlane.xlu0 %2654 }
 0x91d   : > { %v4587_v45 = vpop.eup %4586  ;;  %v2661_v46 = vsub.f32 %v2638_v60, %v2655_v44  ;;  %v2674_v47 = vsel %vm1246_vm10, %v5306_v43, 0.0  ;;  %v3129_v44 = vld [vmem:[%s4941_s16 + $0x8] sm:$0xff] }
 0x91e   : > { %2675 = vadd.xlane.f32.xlu1 %v2674_v47  ;;  %v2671_v48 = vsel %vm1242_vm9, %v4587_v45, 0.0 }
 0x91f   : > { %v2667_v49 = vmul.f32 1.442695, %v2661_v46  ;;  %2672 = vadd.xlane.f32.xlu0 %v2671_v48  ;;  %v3131_v46 = vld [vmem:[%s4941_s16 + $0x18] sm:$0xff] }
 0x920   : > { %v2658_v50 = vpop.xlane.xlu0 %2657 }
 0x921   : > { %4588 = vpow2.f32 %v2667_v49  ;;  %v2662_v53 = vsub.f32 %v4183_v28, %v2658_v50 }
 0x923   : > { %v2669_v55 = vmul.f32 1.442695, %v2662_v53 }
 0x925   : > { %4590 = vpow2.f32 %v2669_v55 }
 0x92b   : > { %v4589_v57 = vpop.eup %4588 }
 0x92c   : > { %v2677_v10 = vsel %vm1242_vm9, %v4589_v57, 0.0 }
 0x92d   : > { %2678 = vadd.xlane.f32.xlu0 %v2677_v10 }
 0x92f   : > { %v5312_v61 = vpop.eup %4590 }
 0x930   : > { %v2680_v13 = vsel %vm1246_vm10, %v5312_v61, 0.0 }
 0x931   : > { %2681 = vadd.xlane.f32.xlu1 %v2680_v13 }
 0x942   : > { %4532 = vrot.lane.b32.xlu1 %v5134_v54, %s4744_s15 }
 0x943   : > { %4527 = vrot.lane.b32.xlu0 %v5126_v52, %s4744_s15 }
 0x946   : > { %3006 = vrot.lane.b32.xlu1 %v2980_v33, %s4745_s14 }
 0x947   : > { %3059 = vrot.lane.b32.xlu0 %v3048_v32, %s4746_s20 }
 0x94a   : > { %3057 = vrot.lane.b32.xlu1 %v3031_v20, %s4746_s20  ;;  %v3056_v20 = vrot.slane %v5302_v30, %v5049_v1 }
 0x94e   : > { %3008 = vrot.lane.b32.xlu1 %v5245_v0, %s4745_s14 }
 0x9ab   : > { %v2676_v52 = vpop.xlane.xlu1 %2675 }
 0x9ac   : > { %v2673_v54 = vpop.xlane.xlu0 %2672 }
 0x9ad   : > { %4592 = vrcp.f32 %v2673_v54 }
 0x9ae   : > { %4594 = vrcp.f32 %v2676_v52  ;;  %v1509_v52 = vcombine.high %v5172_v62, %v5172_v62 }
 0x9b7   : > { %v4593_v21 = vpop.eup %4592 }
 0x9b8   : > { %v2687_v23 = vmul.f32 %v4593_v21, %v4587_v45  ;;  %v4595_v31 = vpop.eup %4594  ;;  %v3130_v45 = vld [vmem:[%s4941_s16 + $0x10] sm:$0xff]  ;;  %v1523_v21 = vrot.slane %v1509_v52, %v5049_v1 }
 0x9b9   : > { %v2688_v37 = vmul.f32 %v4595_v31, %v5306_v43  ;;  %v3128_v43 = vld [vmem:[%s4941_s16] sm:$0xff]  ;;  %v4375_v47 = vpack.c.bf16 %v3131_v46, %v3130_v45  ;;  %s4747_s16 = smov 24  }
 0x9ba   : > { %4188 = vmatprep.mubr.msk.f32.mxu0 %vm1242_vm9, %v2687_v23  ;;  %v2679_v24 = vpop.xlane.xlu0 %2678  ;;  %v4372_v51 = vpack.c.bf16 %v3129_v44, %v3128_v43  ;;  %v1516_v23 = vrot.slane %v5172_v62, %v5049_v1  ;;  %v1525_v58 = vcombine.high %v1523_v21, %v1523_v21  ;;  %v2960_v44 = vrot.slane %v5182_v22, %v5049_v1 }
 0x9bb   : > { %4596 = vrcp.f32 %v2679_v24  ;;  %v3134_v22 = vsub.s32 3, %v5039_v56 }
 0x9be   : > { %v2682_v25 = vpop.xlane.xlu1 %2681  ;;  %v4528_v27 = vpop.permute.xlu0 %4527 }
 0x9bf   : > { %4598 = vrcp.f32 %v2682_v25  ;;  %v4530_v28 = vunpack.i.h.bf16 %v4528_v27  ;;  %v4529_v29 = vunpack.i.l.bf16 %v4528_v27  ;;  %v1524_v25 = vcombine.high %v1516_v23, %v1516_v23 }
 0x9c0   : > { %v2920_v27 = vcombine.low %v1523_v21, %v1525_v58 }
 0x9c1   : > { %v4359_v60 = vpack.c.bf16 %v4530_v28, %v4529_v29  ;;  %v2919_v28 = vcombine.low %v1516_v23, %v1524_v25  ;;  %v3283_v25 = vld [vmem:[%s4947_s22] sm:$0xff] }
 0x9c2   : > { %v4533_v32 = vpop.permute.xlu1 %4532  ;;  %v2934_v30 = vrot.slane %v2920_v27, %v5049_v1  ;;  %v3060_v31 = vpop.permute.xlu0 %3059  ;;  %v3284_v27 = vld [vmem:[%s4947_s22 + $0x8] sm:$0xff] }
 0x9c3   : > { %v4535_v34 = vunpack.i.h.bf16 %v4533_v32  ;;  %v4534_v0 = vunpack.i.l.bf16 %v4533_v32  ;;  %4361 = vmatprep.subr.msk.bf16.mxu0 %vm5120_vm8, %v4359_v60 }
 0x9c4   : > { %4364 = vmatpush3.bf16.msk.msra.mxu0 %vm5120_vm8, %v4359_v60  ;;  %v2927_v60 = vrot.slane %v2919_v28, %v5049_v1  ;;  %v4378_v28 = vpack.c.bf16 %v3284_v27, %v3283_v25 }
 0x9c5   : > { %v4597_v36 = vpop.eup %4596  ;;  %v4365_v38 = vpack.c.bf16 %v4535_v34, %v4534_v0  ;;  %4371 = vmatprep.subr.bf16.mxu0 %v4737_v35 }
 0x9c6   : > { %v2689_v39 = vmul.f32 %v4597_v36, %v4589_v57  ;;  %v3007_v24 = vpop.permute.xlu1 %3006  ;;  %v2935_v32 = vcombine.low %v2927_v60, %v2934_v30  ;;  %v3286_v30 = vld [vmem:[%s4947_s22 + $0x18] sm:$0xff] }
 0x9c7   : > { %4189 = vmatmul.mubr.msk.f32.vlgmr.msra.gmra.mrb[20].mxu0 %vm1242_vm9, %v2688_v37  ;;  %4367 = vmatprep.subr.msk.bf16.mxu1 %vm5120_vm8, %v4365_v38 }
 0x9c8   : > { %4370 = vmatpush3.bf16.msk.msra.mxu1 %vm5120_vm8, %v4365_v38  ;;  %4195 = vmatprep.mubr.msk.f32.mxu1 %vm1242_vm9, %v2689_v39  ;;  %v3117_v0 = vsel %vm1027_vm4, %v2935_v32, %v3007_v24  ;;  %v3387_v32 = vld [vmem:[%s4962_s30 + $0x8] sm:$0xff] }
 0x9c9   : > { %v4599_v40 = vpop.eup %4598  ;;  %4206 = vmatprep.mubr.msk.f32.mxu0 %vm4738_vm2, %v4739_v41  ;;  %4377 = vmatprep.subr.bf16.mxu1 %v4737_v35 }
 0x9ca   : > { %v2690_v42 = vmul.f32 %v4599_v40, %v5312_v61  ;;  %4373 = vmatpush3.bf16.msra.mxu0 %v4372_v51  ;;  %v3058_v29 = vpop.permute.xlu1 %3057 }
 0x9cb   : > { %4374 = vmatprep.subr.bf16.mxu0 %v4737_v35  ;;  %v3121_v36 = vsel %vm3120_vm11, %v3117_v0, %v3058_v29  ;;  %v3285_v29 = vld [vmem:[%s4947_s22 + $0x10] sm:$0xff] }
 0x9cc   : > { %4196 = vmatmul.mubr.msk.f32.vlgmr.msra.gmra.mrb[26].mxu1 %vm1242_vm9, %v2690_v42  ;;  %v4381_v60 = vpack.c.bf16 %v3286_v30, %v3285_v29 }
 0x9cd   : > { %4223 = vmatprep.mubr.msk.f32.mxu1 %vm4738_vm2, %v4739_v41  ;;  %4379 = vmatpush3.bf16.msra.mxu1 %v4378_v28 }
 0x9ce   : > { %4376 = vmatpush3.bf16.msra.mxu0 %v4375_v47  ;;  %v3009_v34 = vpop.permute.xlu1 %3008  ;;  %4380 = vmatprep.subr.bf16.mxu1 %v4737_v35 }
 0x9cf   : > { %4383 = vmatprep.subr.bf16.mxu0 %v4737_v35  ;;  %v3118_v62 = vsel %vm1027_vm4, %v5185_v26, %v3009_v34  ;;  %v3388_v34 = vld [vmem:[%s4962_s30 + $0x10] sm:$0xff] }
 0x9d0   : > { %v3122_v39 = vsel %vm3120_vm11, %v3118_v62, %v3060_v31  ;;  %v3386_v31 = vld [vmem:[%s4962_s30] sm:$0xff] }
 0x9d1   : > { %4382 = vmatpush3.bf16.msra.mxu1 %v4381_v60  ;;  %v4384_v0 = vpack.c.bf16 %v3387_v32, %v3386_v31 }
 0xa9a   : > { %v4190_v48 = vpop.f32.mrb[20].mxu0 }
 0xa9b   : > { %v2770_v49 = vpop.f32.mrb[21].mxu0  ;;  %v2894_v63 = vrot.slane %v4190_v48, %v5049_v1  ;;  %v5412_v48 = vld [vmem:[%s4973_s18] sm:$0xff] }
 0xa9c   : > { %v2871_v50 = vcombine.high %v2770_v49, %v2770_v49  ;;  %v2878_v53 = vrot.slane %v2770_v49, %v5049_v1  ;;  %v3135_v49 = vrot.slane %v5412_v48, %v3134_v22 }
 0xa9e   : > { %v2885_v55 = vrot.slane %v2871_v50, %v5049_v1  ;;  %v2886_v57 = vcombine.high %v2878_v53, %v2878_v53 }
 0xa9f   : > { %v4197_v10 = vpop.f32.mrb[26].mxu1 }
 0xaa0   : > { %v2887_v61 = vcombine.high %v2885_v55, %v2885_v55  ;;  %v3066_v11 = vcombine.low %v2878_v53, %v2886_v57  ;;  %v2858_v13 = vpop.f32.mrb[27].mxu1  ;;  %v2918_v16 = vrot.slane %v4197_v10, %v5049_v1  ;;  %v4613_v57 = vld [vmem:[#allocation2] sm:$0xff] }
 0xaa1   : > { %v2895_v3 = vcombine.high %v2858_v13, %v2858_v13  ;;  %v2902_v4 = vrot.slane %v2858_v13, %v5049_v1 }
 0xaa2   : > { %v3067_v5 = vcombine.low %v2885_v55, %v2887_v61  ;;  %v3074_v14 = vrot.slane %v3066_v11, %v5049_v1 }
 0xaa3   : > { %v2909_v6 = vrot.slane %v2895_v3, %v5049_v1  ;;  %v2910_v7 = vcombine.high %v2902_v4, %v2902_v4  ;;  %v3083_v12 = vcombine.low %v2894_v63, %v2902_v4  ;;  %v4614_v3 = vld [vmem:[#allocation2 + $0x8] sm:$0xff] }
 0xaa4   : > { %v3081_v15 = vrot.slane %v3067_v5, %v5049_v1 }
 0xaa5   : > { %v2911_v17 = vcombine.high %v2909_v6, %v2909_v6  ;;  %v3084_v18 = vcombine.low %v2910_v7, %v2909_v6  ;;  %v3091_v19 = vrot.slane %v3083_v12, %v5049_v1 }
 0xaa6   : > { %v3082_v59 = vcombine.low %v3074_v14, %v3081_v15  ;;  %v4615_v14 = vld [vmem:[#allocation2 + $0x10] sm:$0xf] }
 0xaa7   : > { %v3098_v2 = vrot.slane %v3084_v18, %v5049_v1  ;;  %v3100_v33 = vcombine.low %v2911_v17, %v2918_v16 }
 0xaa8   : > { %3108 = vrot.lane.b32.xlu0 %v3082_v59, %s4747_s16 }
 0xaa9   : > { %v3099_v9 = vcombine.low %v3091_v19, %v3098_v2  ;;  %v3107_v54 = vrot.slane %v3100_v33, %v5049_v1 }
 0xaab   : > { %3110 = vrot.lane.b32.xlu1 %v3099_v9, %s4747_s16 }
 0xaac   : > { %3010 = vrot.lane.b32.xlu0 %v3005_v8, %s4745_s14 }
 0xaaf   : > { %3061 = vrot.lane.b32.xlu1 %v3056_v20, %s4746_s20 }
 0xab0   : > { %3112 = vrot.lane.b32.xlu0 %v3107_v54, %s4747_s16 }
 0xb1a   : > { %v3109_v37 = vpop.permute.xlu0 %3108 }
 0xb1b   : > { %v3125_v38 = vsel %vm3124_vm12, %v3121_v36, %v3109_v37  ;;  %v3389_v36 = vld [vmem:[%s4962_s30 + $0x18] sm:$0xff]  ;;  %v3390_v37 = vld [vmem:[%s4962_s30 + $0x20] sm:$0xff] }
 0xb1c   : > { %4207 = vmatmul.mubr.msk.f32.vlgmr.msra.gmra.mrb[22].mxu0 %vm576_vm3, %v3125_v38  ;;  %v4387_v62 = vpack.c.bf16 %v3389_v36, %v3388_v34  ;;  %v3391_v38 = vld [vmem:[%s4962_s30 + $0x28] sm:$0xff] }
 0xb1d   : > { %v3111_v40 = vpop.permute.xlu1 %3110  ;;  %4209 = vmatprep.mubr.msk.f32.mxu0 %vm4738_vm2, %v4739_v41  ;;  %4385 = vmatpush3.bf16.msra.mxu0 %v4384_v0 }
 0xb1e   : > { %v3126_v42 = vsel %vm3124_vm12, %v3122_v39, %v3111_v40  ;;  %v3011_v43 = vpop.permute.xlu0 %3010  ;;  %4386 = vmatprep.subr.bf16.mxu0 %v4737_v35  ;;  %v4390_v39 = vpack.c.bf16 %v3391_v38, %v3390_v37 }
 0xb1f   : > { %v3119_v26 = vsel %vm1027_vm4, %v2960_v44, %v3011_v43 }
 0xb20   : > { %4210 = vmatmul.mubr.msk.f32.gmra.mrb[24].mxu0 %vm576_vm3, %v3126_v42 }
 0xb21   : > { %v3062_v45 = vpop.permute.xlu1 %3061  ;;  %4212 = vmatprep.mubr.msk.f32.mxu0 %vm4738_vm2, %v4739_v41  ;;  %4388 = vmatpush3.bf16.msra.mxu0 %v4387_v62 }
 0xb22   : > { %v3123_v51 = vsel %vm3120_vm11, %v3119_v26, %v3062_v45  ;;  %v3113_v46 = vpop.permute.xlu0 %3112  ;;  %4389 = vmatprep.subr.bf16.mxu0 %v4737_v35 }
 0xb23   : > { %v3127_v47 = vsel %vm3124_vm12, %v3123_v51, %v3113_v46 }
 0xb24   : > { %4213 = vmatmul.mubr.msk.f32.gmra.mrb[26].mxu0 %vm576_vm3, %v3127_v47  ;;  %v3271_v47 = vsub.s32 4, %v5039_v56 }
 0xb25   : > { %4248 = vmatprep.mubr.msk.f32.mxu0 %vm4738_vm2, %v4739_v41  ;;  %4391 = vmatpush3.bf16.msra.mxu0 %v4390_v39 }
 0xb26   : > { %4392 = vmatprep.subr.bf16.mxu0 %v4737_v35 }
 0xbef   : > { %v3211_v50 = vpop.f32.mrb[22].mxu0 }
 0xbf0   : > { %v3212_v53 = vadd.f32 %v3211_v50, %v3135_v49  ;;  %v4208_v55 = vpop.f32.mrb[23].mxu0  ;;  %v3272_v50 = vrot.slane %v5412_v48, %v3271_v47 }
 0xbf2   : > { %v3225_v10 = vadd.f32 %v4613_v57, %v3212_v53 }
 0xbf3   : > { %v3216_v61 = vpop.f32.mrb[24].mxu0 }
 0xbf4   : > { %v3217_v11 = vadd.f32 %v3216_v61, %v3135_v49  ;;  %v4211_v13 = vpop.f32.mrb[25].mxu0  ;;  %v3228_v63 = vsel %vm576_vm3, %v3225_v10, 0.0 }
 0xbf5   : > { %3229 = vadd.xlane.f32.xlu1 %v3228_v63 }
 0xbf6   : > { %v3226_v4 = vadd.f32 %v4614_v3, %v3217_v11 }
 0xbf7   : > { %v3221_v5 = vpop.f32.mrb[26].mxu0 }
 0xbf8   : > { %v3222_v6 = vadd.f32 %v3221_v5, %v3135_v49  ;;  %v4214_v7 = vpop.f32.mrb[27].mxu0  ;;  %v3231_v12 = vsel %vm576_vm3, %v3226_v4, 0.0  ;;  %v3278_v49 = vsub.s32 5, %v5039_v56 }
 0xbf9   : > { %3232 = vadd.xlane.f32.xlu0 %v3231_v12  ;;  %v3392_v7 = vld [vmem:[%s4962_s30 + $0x30] sm:$0xff]  ;;  %v3393_v12 = vld [vmem:[%s4962_s30 + $0x38] sm:$0xff] }
 0xbfa   : > { %v3227_v15 = vadd.f32 %v4615_v14, %v3222_v6  ;;  %v3279_v55 = vrot.slane %v5412_v48, %v3278_v49  ;;  %v4393_v14 = vpack.c.bf16 %v3393_v12, %v3392_v7  ;;  %v3915_v7 = vld [vmem:[%s4973_s18 + $0x8] ss:$0 sm:$0xff] }
 0xbfc   : > { %v3235_v16 = vsel %vm3234_vm13, %v3227_v15, 0.0  ;;  %4394 = vmatpush3.bf16.msra.mxu0 %v4393_v14 }
 0xbfd   : > { %3236 = vadd.xlane.f32.xlu0 %v3235_v16 }
 0xc82   : > { %v3230_v17 = vpop.xlane.xlu1 %3229 }
 0xc83   : > { %v3239_v18 = vmul.f32 0.03125, %v3230_v17 }
 0xc85   : > { %v3242_v59 = vsub.f32 %v3225_v10, %v3239_v18 }
 0xc86   : > { %v3233_v19 = vpop.xlane.xlu0 %3232 }
 0xc87   : > { %v3240_v2 = vmul.f32 0.03125, %v3233_v19  ;;  %v3245_v33 = vmul.f32 %v3242_v59, %v3242_v59 }
 0xc89   : > { %v3243_v9 = vsub.f32 %v3226_v4, %v3240_v2  ;;  %v3248_v8 = vsel %vm576_vm3, %v3245_v33, 0.0 }
 0xc8a   : > { %3249 = vadd.xlane.f32.xlu0 %v3248_v8  ;;  %v3237_v20 = vpop.xlane.xlu0 %3236 }
 0xc8b   : > { %v3241_v54 = vmul.f32 0.03125, %v3237_v20  ;;  %v3246_v52 = vmul.f32 %v3243_v9, %v3243_v9 }
 0xc8d   : > { %v3244_v21 = vsub.f32 %v3227_v15, %v3241_v54  ;;  %v3251_v23 = vsel %vm576_vm3, %v3246_v52, 0.0  ;;  %v3908_v15 = vld [vmem:[%s445_s3] ss:$0 sm:$0xff] }
 0xc8e   : > { %3252 = vadd.xlane.f32.xlu1 %v3251_v23 }
 0xc8f   : > { %v3247_v58 = vmul.f32 %v3244_v21, %v3244_v21 }
 0xc91   : > { %v3254_v24 = vsel %vm3234_vm13, %v3247_v58, 0.0 }
 0xc92   : > { %3255 = vadd.xlane.f32.xlu0 %v3254_v24 }
 0xd17   : > { %v3250_v40 = vpop.xlane.xlu0 %3249 }
 0xd18   : > { %v3257_v42 = vmul.f32 0.03125, %v3250_v40 }
 0xd1a   : > { %v3260_v43 = vadd.f32 1e-05, %v3257_v42 }
 0xd1b   : > { %v3253_v44 = vpop.xlane.xlu1 %3252 }
 0xd1c   : > { %4600 = vrsqrt.f32 %v3260_v43  ;;  %v3258_v26 = vmul.f32 0.03125, %v3253_v44 }
 0xd1e   : > { %v3261_v45 = vadd.f32 1e-05, %v3258_v26 }
 0xd1f   : > { %v3256_v51 = vpop.xlane.xlu0 %3255 }
 0xd20   : > { %4602 = vrsqrt.f32 %v3261_v45  ;;  %v3259_v46 = vmul.f32 0.03125, %v3256_v51 }
 0xd22   : > { %v3262_v22 = vadd.f32 1e-05, %v3259_v46 }
 0xd24   : > { %4604 = vrsqrt.f32 %v3262_v22 }
 0xd26   : > { %v4601_v53 = vpop.eup %4600 }
 0xd27   : > { %v3266_v35 = vmul.f32 %v4601_v53, %v3242_v59 }
 0xd29   : > { %v3273_v57 = vmul.f32 %v3272_v50, %v3266_v35 }
 0xd2a   : > { %v4603_v10 = vpop.eup %4602 }
 0xd2b   : > { %v3280_v61 = vadd.f32 %v3279_v55, %v3273_v57  ;;  %v3267_v11 = vmul.f32 %v4603_v10, %v3243_v9 }
 0xd2d   : > { %4224 = vmatmul.mubr.msk.f32.vlgmr.msra.gmra.mrb[28].mxu1 %vm576_vm3, %v3280_v61  ;;  %v3274_v13 = vmul.f32 %v3272_v50, %v3267_v11 }
 0xd2e   : > { %v4605_v63 = vpop.eup %4604  ;;  %4226 = vmatprep.mubr.msk.f32.mxu1 %vm4738_vm2, %v4739_v41 }
 0xd2f   : > { %v3281_v3 = vadd.f32 %v3279_v55, %v3274_v13  ;;  %v3268_v4 = vmul.f32 %v4605_v63, %v3244_v21  ;;  %v3396_v21 = vsub.s32 6, %v5039_v56  ;;  %v3532_v63 = vsub.s32 7, %v5039_v56 }
 0xd31   : > { %4227 = vmatmul.mubr.msk.f32.gmra.mrb[30].mxu1 %vm576_vm3, %v3281_v3  ;;  %v3275_v5 = vmul.f32 %v3272_v50, %v3268_v4  ;;  %v3397_v23 = vrot.slane %v5412_v48, %v3396_v21  ;;  %v3533_v4 = vrot.slane %v5412_v48, %v3532_v63 }
 0xd32   : > { %4229 = vmatprep.mubr.msk.f32.mxu1 %vm4738_vm2, %v4739_v41 }
 0xd33   : > { %v3282_v6 = vadd.f32 %v3279_v55, %v3275_v5 }
 0xd35   : > { %4230 = vmatmul.mubr.msk.f32.gmra.mrb[32].mxu1 %vm576_vm3, %v3282_v6 }
 0xe00   : > { %v3369_v16 = vpop.f32.mrb[28].mxu1 }
 0xe01   : > { %v3370_v17 = vadd.f32 %v3908_v15, %v3369_v16  ;;  %v4225_v18 = vpop.f32.mrb[29].mxu1 }
 0xe03   : > { %v3383_v59 = vmax.f32 %v3370_v17, 0.0 }
 0xe04   : > { %v3374_v19 = vpop.f32.mrb[30].mxu1 }
 0xe05   : > { %v3375_v2 = vadd.f32 %v3908_v15, %v3374_v19  ;;  %v4228_v33 = vpop.f32.mrb[31].mxu1  ;;  %4249 = vmatmul.mubr.msk.f32.vlgmr.msra.gmra.mrb[28].mxu0 %vm3398_vm14, %v3383_v59 }
 0xe06   : > { %4251 = vmatprep.mubr.msk.f32.mxu0 %vm4738_vm2, %v4739_v41 }
 0xe07   : > { %v3384_v9 = vmax.f32 %v3375_v2, 0.0 }
 0xe08   : > { %v3379_v8 = vpop.f32.mrb[32].mxu1 }
 0xe09   : > { %v3380_v20 = vadd.f32 %v3908_v15, %v3379_v8  ;;  %v4231_v54 = vpop.f32.mrb[33].mxu1  ;;  %4252 = vmatmul.mubr.msk.f32.gmra.mrb[30].mxu0 %vm3398_vm14, %v3384_v9 }
 0xe0a   : > { %4254 = vmatprep.mubr.msk.f32.mxu0 %vm4738_vm2, %v4739_v41 }
 0xe0b   : > { %v3385_v52 = vmax.f32 %v3380_v20, 0.0 }
 0xe0d   : > { %4255 = vmatmul.mubr.msk.f32.gmra.mrb[32].mxu0 %vm3398_vm14, %v3385_v52 }
 0xed8   : > { %v3474_v58 = vpop.f32.mrb[28].mxu0 }
 0xed9   : > { %v3475_v24 = vadd.f32 %v3474_v58, %v3397_v23  ;;  %v4250_v25 = vpop.f32.mrb[29].mxu0 }
 0xedb   : > { %v3488_v27 = vadd.f32 %v3475_v24, %v3280_v61 }
 0xedc   : > { %v3479_v28 = vpop.f32.mrb[30].mxu0 }
 0xedd   : > { %v3480_v29 = vadd.f32 %v3479_v28, %v3397_v23  ;;  %v4253_v30 = vpop.f32.mrb[31].mxu0  ;;  %v3491_v60 = vsel %vm576_vm3, %v3488_v27, 0.0 }
 0xede   : > { %3492 = vadd.xlane.f32.xlu1 %v3491_v60 }
 0xedf   : > { %v3489_v31 = vadd.f32 %v3480_v29, %v3281_v3 }
 0xee0   : > { %v3484_v32 = vpop.f32.mrb[32].mxu0 }
 0xee1   : > { %v3485_v34 = vadd.f32 %v3484_v32, %v3397_v23  ;;  %v4256_v41 = vpop.f32.mrb[33].mxu0  ;;  %v3494_v0 = vsel %vm576_vm3, %v3489_v31, 0.0 }
 0xee2   : > { %3495 = vadd.xlane.f32.xlu0 %v3494_v0 }
 0xee3   : > { %v3490_v36 = vadd.f32 %v3485_v34, %v3282_v6 }
 0xee5   : > { %v3497_v62 = vsel %vm3234_vm13, %v3490_v36, 0.0 }
 0xee6   : > { %3498 = vadd.xlane.f32.xlu1 %v3497_v62 }
 0xf6b   : > { %v3493_v37 = vpop.xlane.xlu1 %3492 }
 0xf6c   : > { %v3500_v38 = vmul.f32 0.03125, %v3493_v37 }
 0xf6e   : > { %v3503_v39 = vsub.f32 %v3488_v27, %v3500_v38 }
 0xf6f   : > { %v3496_v40 = vpop.xlane.xlu0 %3495 }
 0xf70   : > { %v3501_v42 = vmul.f32 0.03125, %v3496_v40  ;;  %v3506_v43 = vmul.f32 %v3503_v39, %v3503_v39 }
 0xf72   : > { %v3504_v44 = vsub.f32 %v3489_v31, %v3501_v42  ;;  %v3509_v26 = vsel %vm576_vm3, %v3506_v43, 0.0 }
 0xf73   : > { %3510 = vadd.xlane.f32.xlu0 %v3509_v26  ;;  %v3499_v45 = vpop.xlane.xlu1 %3498 }
 0xf74   : > { %v3502_v51 = vmul.f32 0.03125, %v3499_v45  ;;  %v3507_v46 = vmul.f32 %v3504_v44, %v3504_v44 }
 0xf76   : > { %v3505_v47 = vsub.f32 %v3490_v36, %v3502_v51  ;;  %v3512_v22 = vsel %vm576_vm3, %v3507_v46, 0.0 }
 0xf77   : > { %3513 = vadd.xlane.f32.xlu1 %v3512_v22 }
 0xf78   : > { %v3508_v49 = vmul.f32 %v3505_v47, %v3505_v47 }
 0xf7a   : > { %v3515_v50 = vsel %vm3234_vm13, %v3508_v49, 0.0 }
 0xf7b   : > { %3516 = vadd.xlane.f32.xlu0 %v3515_v50 }
0x1000   : > { %v3511_v53 = vpop.xlane.xlu0 %3510 }
0x1001   : > { %v3518_v35 = vmul.f32 0.03125, %v3511_v53 }
0x1003   : > { %v3521_v55 = vadd.f32 1e-05, %v3518_v35 }
0x1004   : > { %v3514_v57 = vpop.xlane.xlu1 %3513 }
0x1005   : > { %4606 = vrsqrt.f32 %v3521_v55  ;;  %v3519_v10 = vmul.f32 0.03125, %v3514_v57 }
0x1007   : > { %v3522_v61 = vadd.f32 1e-05, %v3519_v10 }
0x1008   : > { %v3517_v11 = vpop.xlane.xlu0 %3516 }
0x1009   : > { %4608 = vrsqrt.f32 %v3522_v61  ;;  %v3520_v13 = vmul.f32 0.03125, %v3517_v11 }
0x100b   : > { %v3523_v3 = vadd.f32 1e-05, %v3520_v13 }
0x100d   : > { %4610 = vrsqrt.f32 %v3523_v3 }
0x100f   : > { %v4607_v5 = vpop.eup %4606 }
0x1010   : > { %v3527_v6 = vmul.f32 %v4607_v5, %v3503_v39 }
0x1012   : > { %v3534_v12 = vmul.f32 %v3533_v4, %v3527_v6 }
0x1013   : > { %v4609_v14 = vpop.eup %4608 }
0x1014   : > { %v3541_v15 = vadd.f32 %v3915_v7, %v3534_v12  ;;  %v3528_v16 = vmul.f32 %v4609_v14, %v3504_v44 }
0x1016   : > { %3544 = vst.msk [vmem:[#allocation2] sm:$0xff] %vm576_vm3, %v3541_v15  ;;  %v3535_v17 = vmul.f32 %v3533_v4, %v3528_v16  ;;  %v3554_v48 = vcombine.high (!%p3916_p4), %v3541_v15, %v3541_v15  ;;  %v3561_v33 = vrot.slane (!%p3916_p4), %v3541_v15, %v5049_v1 }
0x1017   : > { %v4611_v18 = vpop.eup %4610 }
0x1018   : > { %v3542_v59 = vadd.f32 %v3915_v7, %v3535_v17  ;;  %v3529_v19 = vmul.f32 %v4611_v18, %v3505_v47  ;;  %3550 = sbr.rel (%p3916_p4) target bundleno = 4135 (0x1027), region = 64  ;;  %v3568_v54 = vrot.slane (!%p3916_p4), %v3554_v48, %v5049_v1  ;;  %v3569_v52 = vcombine.high (!%p3916_p4), %v3561_v33, %v3561_v33 }
0x101a   : > { %3545 = vst.msk [vmem:[#allocation2 + $0x8] sm:$0xff] %vm576_vm3, %v3542_v59  ;;  %v3536_v56 = vmul.f32 %v3533_v4, %v3529_v19  ;;  %v3578_v9 = vrot.slane (!%p3916_p4), %v3542_v59, %v5049_v1  ;;  %v3571_v8 = vcombine.high (!%p3916_p4), %v3542_v59, %v3542_v59  ;;  %v3570_v25 = vcombine.high (!%p3916_p4), %v3568_v54, %v3568_v54 }
0x101b   : > { %v3596_v27 = vcombine.low (!%p3916_p4), %v3561_v33, %v3569_v52 }
0x101c   : > { %v3543_v2 = vadd.f32 %v3915_v7, %v3536_v56  ;;  %v3619_v21 = vrot.slane (!%p3916_p4), %v3578_v9, %v5049_v1  ;;  %v3586_v23 = vcombine.high (!%p3916_p4), %v3578_v9, %v3578_v9  ;;  %v3585_v58 = vrot.slane (!%p3916_p4), %v3571_v8, %v5049_v1 }
0x101d   : > { %v3597_v60 = vcombine.low (!%p3916_p4), %v3568_v54, %v3570_v25  ;;  %v3604_v31 = vrot.slane (!%p3916_p4), %v3596_v27, %v5049_v1 }
0x101e   : > { %3546 = vst.msk [vmem:[#allocation2 + $0x10] sm:$0xf] %vm3234_vm13, %v3543_v2  ;;  %v3594_v20 = vrot.slane (!%p3916_p4), %v3543_v2, %v5049_v1  ;;  %v3587_v28 = vcombine.high (!%p3916_p4), %v3585_v58, %v3585_v58  ;;  %v3620_v29 = vcombine.low (!%p3916_p4), %v3586_v23, %v3585_v58 }
0x101f   : > { %3650 = vst.msk [vmem:[%s5524_s7 + $0x8] sm:$0x3] %vm3649_vm15, %v3619_v21  ;;  %v3611_v41 = vrot.slane %v3597_v60, %v5049_v1 }
0x1020   : > { %v3595_v24 = vcombine.high %v3594_v20, %v3594_v20  ;;  %v3621_v32 = vcombine.low %v3587_v28, %v3594_v20  ;;  %v3628_v34 = vrot.slane %v3620_v29, %v5049_v1 }
0x1021   : > { %v3612_v36 = vcombine.low %v3604_v31, %v3611_v41 }
0x1022   : > { %v3643_v30 = vrot.slane %v3595_v24, %v5049_v1  ;;  %v3635_v0 = vrot.slane %v3621_v32, %v5049_v1 }
0x1023   : > { %3648 = vst.msk [vmem:[%s5524_s7] sm:$0xff] %vm576_vm3, %v3612_v36 }
0x1024   : > { %3652 = vst.msk [vmem:[%s5524_s7 + $0x18] sm:$0x3] %vm3649_vm15, %v3643_v30  ;;  %v3636_v62 = vcombine.low %v3628_v34, %v3635_v0 }
0x1026   : > { %3651 = vst.msk [vmem:[%s5524_s7 + $0x10] sm:$0xff] %vm576_vm3, %v3636_v62 }
0x1027 PF: > { %s23_s29 = sadd.s32 1, %s4730_s29   ;;  %s5541_s24 = smov %s4714_s25 }
0x1028   : > { %p20_p8 = scmp.ge.s32.totalorder %s23_s29, 4   ;;  %s5542_s25 = smov %s4718_s26 }
0x1029   : > { %s5543_s26 = smov %s4837_s13  ;;  %s5544_s27 = smov %s4726_s28 }
0x102a   : > { %s5545_s28 = smov %s5547_s8  ;;  %22 = sbr.rel (!%p20_p8) target bundleno = 9 (0x9), region = 126 }
0x1031   :  { %3677 = vsyncpa [#allocation4], 1 }
0x1032   :  { %3679 = vsyncpa [#allocation4 + $0x1], 1 }
0x1033   :  { %3680 = vsyncpa [#allocation6], 1 }
0x1034   :  { %3682 = vsyncpa [#allocation6 + $0x1], 1 }

</bundles_post_ra>
